<compile_context>
chip_gen: v6e
topology: v6e:2x2x1
jax: 0.10.0
libtpu: 0.0.40
codegen_flags: <defaults>
</compile_context>

<pallas_src>
import functools
import math

import jax
import jax.numpy as jnp
from jax.experimental import pallas as pl
from jax.experimental.pallas import tpu as pltpu

# ----------------------------- config (small synthetic BERT) -----------------------------
VOCAB = 100
MAX_POS = 64
TYPE_VOCAB = 2
HIDDEN = 32
N_HEADS = 4
HEAD_DIM = HIDDEN // N_HEADS
INTERMEDIATE = 128
N_LAYERS = 2
SEQ = 8
LN_EPS = 1e-12


# ----------------------------- fused Pallas kernel -----------------------------
def _bert_kernel(emb_ref, emb_g_ref, emb_b_ref,
                 wqkv_ref, bqkv_ref, wo_ref, bo_ref,
                 ln1_g_ref, ln1_b_ref,
                 wi_ref, bi_ref, wf_ref, bf_ref,
                 ln2_g_ref, ln2_b_ref,
                 o_ref):
    """Whole BERT encoder forward on VMEM-resident weights.

    Stacked weight refs carry a leading layer axis of size N_LAYERS; the layer
    loop is a static Python loop, so all slicing is static.
    """

    def layernorm(h, g, b):
        # biased variance, eps=1e-12 (matches PyTorch/HF BERT)
        mu = jnp.mean(h, axis=-1, keepdims=True)
        d = h - mu
        var = jnp.mean(d * d, axis=-1, keepdims=True)
        return d * jax.lax.rsqrt(var + LN_EPS) * g + b

    # embedding LayerNorm (no residual)
    x = layernorm(emb_ref[...], emb_g_ref[...], emb_b_ref[...])

    for l in range(N_LAYERS):
        # ---- self-attention: fused QKV projection (scale already folded into Q) ----
        qkv = jnp.dot(x, wqkv_ref[l], preferred_element_type=jnp.float32) + bqkv_ref[l]
        q = qkv[:, 0 * HIDDEN:1 * HIDDEN]
        k = qkv[:, 1 * HIDDEN:2 * HIDDEN]
        v = qkv[:, 2 * HIDDEN:3 * HIDDEN]

        ctx_heads = []
        for h in range(N_HEADS):
            lo = h * HEAD_DIM
            hi = lo + HEAD_DIM
            qh = q[:, lo:hi]
            kh = k[:, lo:hi]
            vh = v[:, lo:hi]
            # scores = qh @ kh^T  (contraction over head_dim, no explicit transpose)
            s = jax.lax.dot_general(qh, kh, (((1,), (1,)), ((), ())),
                                    preferred_element_type=jnp.float32)
            m = jnp.max(s, axis=-1, keepdims=True)
            p = jnp.exp(s - m)
            p = p * pl.reciprocal(jnp.sum(p, axis=-1, keepdims=True), approx=True)
            ctx_heads.append(jnp.dot(p, vh, preferred_element_type=jnp.float32))
        ctx = jnp.concatenate(ctx_heads, axis=-1)                     # (S, HIDDEN)

        # output projection + residual + LayerNorm (fused epilogue)
        attn_out = jnp.dot(ctx, wo_ref[l], preferred_element_type=jnp.float32) + bo_ref[l]
        x = layernorm(attn_out + x, ln1_g_ref[l], ln1_b_ref[l])

        # ---- feed-forward: matmul + bias + exact GELU, matmul + bias + residual + LN ----
        inter = jnp.dot(x, wi_ref[l], preferred_element_type=jnp.float32) + bi_ref[l]
        inter = 0.5 * inter * (1.0 + jax.lax.erf(inter * (1.0 / math.sqrt(2.0))))
        ffn = jnp.dot(inter, wf_ref[l], preferred_element_type=jnp.float32) + bf_ref[l]
        x = layernorm(ffn + x, ln2_g_ref[l], ln2_b_ref[l])

    o_ref[...] = x


def _vmem_spec():
    return pl.BlockSpec(memory_space=pltpu.MemorySpace.VMEM)


def bert_encoder(emb, emb_g, emb_b, fused):
    S = emb.shape[0]
    return pl.pallas_call(
        _bert_kernel,
        out_shape=jax.ShapeDtypeStruct((S, HIDDEN), jnp.float32),
        in_specs=[_vmem_spec()] * 15,
        out_specs=_vmem_spec(),
    )(emb, emb_g, emb_b,
      fused["wqkv"], fused["bqkv"], fused["wo"], fused["bo"],
      fused["ln1_g"], fused["ln1_b"],
      fused["wi"], fused["bi"], fused["wf"], fused["bf"],
      fused["ln2_g"], fused["ln2_b"])


# ----------------------------- parameter init (deterministic) -----------------------------
def init_params(key):
    std = 0.02
    keys = iter(jax.random.split(key, 8 + N_LAYERS * 16))

    def nrm(shape):
        return (std * jax.random.normal(next(keys), shape)).astype(jnp.float32)

    params = {
        "word_emb": nrm((VOCAB, HIDDEN)),
        "pos_emb": nrm((MAX_POS, HIDDEN)),
        "type_emb": nrm((TYPE_VOCAB, HIDDEN)),
        "emb_ln_g": jnp.ones((1, HIDDEN), jnp.float32),
        "emb_ln_b": jnp.zeros((1, HIDDEN), jnp.float32),
        "layers": [],
    }
    for _ in range(N_LAYERS):
        layer = {
            "wq": nrm((HIDDEN, HIDDEN)), "bq": jnp.zeros((1, HIDDEN), jnp.float32),
            "wk": nrm((HIDDEN, HIDDEN)), "bk": jnp.zeros((1, HIDDEN), jnp.float32),
            "wv": nrm((HIDDEN, HIDDEN)), "bv": jnp.zeros((1, HIDDEN), jnp.float32),
            "wo": nrm((HIDDEN, HIDDEN)), "bo": jnp.zeros((1, HIDDEN), jnp.float32),
            "ln1_g": jnp.ones((1, HIDDEN), jnp.float32),
            "ln1_b": jnp.zeros((1, HIDDEN), jnp.float32),
            "wi": nrm((HIDDEN, INTERMEDIATE)), "bi": jnp.zeros((1, INTERMEDIATE), jnp.float32),
            "wf": nrm((INTERMEDIATE, HIDDEN)), "bf": jnp.zeros((1, HIDDEN), jnp.float32),
            "ln2_g": jnp.ones((1, HIDDEN), jnp.float32),
            "ln2_b": jnp.zeros((1, HIDDEN), jnp.float32),
        }
        params["layers"].append(layer)
    return params


def fuse_params(params):
    """Stack per-layer weights along a leading layer axis; fuse Q|K|V and fold
    the 1/sqrt(head_dim) attention scale into the Q weights/bias."""
    scale = 1.0 / math.sqrt(HEAD_DIM)
    acc = {k: [] for k in ("wqkv", "bqkv", "wo", "bo", "ln1_g", "ln1_b",
                           "wi", "bi", "wf", "bf", "ln2_g", "ln2_b")}
    for lyr in params["layers"]:
        acc["wqkv"].append(jnp.concatenate(
            [lyr["wq"] * scale, lyr["wk"], lyr["wv"]], axis=1))          # (H, 3H)
        acc["bqkv"].append(jnp.concatenate(
            [lyr["bq"] * scale, lyr["bk"], lyr["bv"]], axis=1))          # (1, 3H)
        acc["wo"].append(lyr["wo"]);   acc["bo"].append(lyr["bo"])
        acc["ln1_g"].append(lyr["ln1_g"]); acc["ln1_b"].append(lyr["ln1_b"])
        acc["wi"].append(lyr["wi"]);   acc["bi"].append(lyr["bi"])
        acc["wf"].append(lyr["wf"]);   acc["bf"].append(lyr["bf"])
        acc["ln2_g"].append(lyr["ln2_g"]); acc["ln2_b"].append(lyr["ln2_b"])
    return {k: jnp.stack(v, axis=0) for k, v in acc.items()}


# ----------------------------- BERT forward -----------------------------
@functools.partial(jax.jit, static_argnums=())
def bert_forward(params, fused, input_ids):
    # input_ids: (1, S) int32  (mirrors tokens.unsqueeze(0) in the PyTorch module)
    ids = input_ids[0]                                   # (S,)
    S = ids.shape[0]

    # embedding gathers are XLA glue; sum once, LN happens inside the fused kernel
    word = jnp.take(params["word_emb"], ids, axis=0)     # (S, H)
    pos = params["pos_emb"][:S]                          # (S, H)
    typ = jnp.take(params["type_emb"], jnp.zeros((S,), jnp.int32), axis=0)
    emb = word + pos + typ

    x = bert_encoder(emb, params["emb_ln_g"], params["emb_ln_b"], fused)
    return x[None, :, :]   # (1, S, HIDDEN) == last_hidden_states


# ----------------------------- main -----------------------------
if __name__ == "__main__":
    key = jax.random.PRNGKey(0)
    pkey, ikey = jax.random.split(key)
    params = init_params(pkey)
    fused = fuse_params(params)

    # synthetic "tokenized sentence": deterministic input ids, truncated to <= 512 (here SEQ=8)
    input_ids = jax.random.randint(ikey, (1, SEQ), 0, VOCAB, dtype=jnp.int32)

    last_hidden_states = bert_forward(params, fused, input_ids)
    last_hidden_states = jax.block_until_ready(last_hidden_states)

    assert last_hidden_states.shape == (1, SEQ, HIDDEN)
    assert bool(jnp.all(jnp.isfinite(last_hidden_states)))
    print("KERNEL_OK")
</pallas_src>

<mosaic_0001>
module attributes {stable_mosaic.version = 11 : i64} {
  func.func @_bert_kernel(%arg0: memref<8x32xf32, #tpu.memory_space<vmem>>, %arg1: memref<1x32xf32, #tpu.memory_space<vmem>>, %arg2: memref<1x32xf32, #tpu.memory_space<vmem>>, %arg3: memref<2x32x96xf32, #tpu.memory_space<vmem>>, %arg4: memref<2x1x96xf32, #tpu.memory_space<vmem>>, %arg5: memref<2x32x32xf32, #tpu.memory_space<vmem>>, %arg6: memref<2x1x32xf32, #tpu.memory_space<vmem>>, %arg7: memref<2x1x32xf32, #tpu.memory_space<vmem>>, %arg8: memref<2x1x32xf32, #tpu.memory_space<vmem>>, %arg9: memref<2x32x128xf32, #tpu.memory_space<vmem>>, %arg10: memref<2x1x128xf32, #tpu.memory_space<vmem>>, %arg11: memref<2x128x32xf32, #tpu.memory_space<vmem>>, %arg12: memref<2x1x32xf32, #tpu.memory_space<vmem>>, %arg13: memref<2x1x32xf32, #tpu.memory_space<vmem>>, %arg14: memref<2x1x32xf32, #tpu.memory_space<vmem>>, %arg15: memref<8x32xf32, #tpu.memory_space<vmem>>) attributes {dimension_semantics = [], scalar_prefetch = 0 : i64, scratch_operands = 0 : i64, tpu.core_type = #tpu.core_type<tc>} {
    %c0 = arith.constant 0 : index
    %c0_0 = arith.constant 0 : index
    %0 = vector.load %arg0[%c0, %c0_0] : memref<8x32xf32, #tpu.memory_space<vmem>>, vector<8x32xf32>
    %c0_1 = arith.constant 0 : index
    %c0_2 = arith.constant 0 : index
    %1 = vector.load %arg1[%c0_1, %c0_2] : memref<1x32xf32, #tpu.memory_space<vmem>>, vector<1x32xf32>
    %c0_3 = arith.constant 0 : index
    %c0_4 = arith.constant 0 : index
    %2 = vector.load %arg2[%c0_3, %c0_4] : memref<1x32xf32, #tpu.memory_space<vmem>>, vector<1x32xf32>
    %cst = arith.constant dense<0.000000e+00> : vector<8xf32>
    %3 = vector.multi_reduction <add>, %0, %cst [1] : vector<8x32xf32> to vector<8xf32>
    %4 = vector.shape_cast %3 : vector<8xf32> to vector<8x1xf32>
    %cst_5 = arith.constant 3.200000e+01 : f32
    %5 = vector.broadcast %cst_5 : f32 to vector<8x1xf32>
    %6 = arith.divf %4, %5 : vector<8x1xf32>
    %7 = vector.broadcast %6 : vector<8x1xf32> to vector<8x32xf32>
    %8 = arith.subf %0, %7 : vector<8x32xf32>
    %9 = arith.mulf %8, %8 : vector<8x32xf32>
    %cst_6 = arith.constant dense<0.000000e+00> : vector<8xf32>
    %10 = vector.multi_reduction <add>, %9, %cst_6 [1] : vector<8x32xf32> to vector<8xf32>
    %11 = vector.shape_cast %10 : vector<8xf32> to vector<8x1xf32>
    %cst_7 = arith.constant 3.200000e+01 : f32
    %12 = vector.broadcast %cst_7 : f32 to vector<8x1xf32>
    %13 = arith.divf %11, %12 : vector<8x1xf32>
    %cst_8 = arith.constant 9.99999996E-13 : f32
    %14 = vector.broadcast %cst_8 : f32 to vector<8x1xf32>
    %15 = arith.addf %13, %14 : vector<8x1xf32>
    %16 = math.rsqrt %15 : vector<8x1xf32>
    %17 = vector.broadcast %16 : vector<8x1xf32> to vector<8x32xf32>
    %18 = arith.mulf %8, %17 : vector<8x32xf32>
    %19 = vector.broadcast %1 : vector<1x32xf32> to vector<8x32xf32>
    %20 = arith.mulf %18, %19 : vector<8x32xf32>
    %21 = vector.broadcast %2 : vector<1x32xf32> to vector<8x32xf32>
    %22 = arith.addf %20, %21 : vector<8x32xf32>
    %c0_9 = arith.constant 0 : index
    %c0_10 = arith.constant 0 : index
    %c0_11 = arith.constant 0 : index
    %23 = vector.load %arg3[%c0_9, %c0_10, %c0_11] : memref<2x32x96xf32, #tpu.memory_space<vmem>>, vector<1x32x96xf32>
    %24 = vector.shape_cast %23 : vector<1x32x96xf32> to vector<32x96xf32>
    %cst_12 = arith.constant dense<0.000000e+00> : vector<8x96xf32>
    %25 = tpu.matmul %22, %24, %cst_12 {dimension_numbers = #tpu.dot_dimension_numbers<[1], [0], [0], [1], [0, 0, 1, 1], [], []>} : vector<8x32xf32>, vector<32x96xf32>, vector<8x96xf32> -> vector<8x96xf32>
    %c0_13 = arith.constant 0 : index
    %c0_14 = arith.constant 0 : index
    %c0_15 = arith.constant 0 : index
    %26 = vector.load %arg4[%c0_13, %c0_14, %c0_15] : memref<2x1x96xf32, #tpu.memory_space<vmem>>, vector<1x1x96xf32>
    %27 = vector.shape_cast %26 : vector<1x1x96xf32> to vector<1x96xf32>
    %28 = vector.broadcast %27 : vector<1x96xf32> to vector<8x96xf32>
    %29 = arith.addf %25, %28 : vector<8x96xf32>
    %30 = vector.extract_strided_slice %29 {offsets = [0, 0], sizes = [8, 32], strides = [1, 1]} : vector<8x96xf32> to vector<8x32xf32>
    %31 = vector.extract_strided_slice %29 {offsets = [0, 32], sizes = [8, 32], strides = [1, 1]} : vector<8x96xf32> to vector<8x32xf32>
    %32 = vector.extract_strided_slice %29 {offsets = [0, 64], sizes = [8, 32], strides = [1, 1]} : vector<8x96xf32> to vector<8x32xf32>
    %33 = vector.extract_strided_slice %30 {offsets = [0, 0], sizes = [8, 8], strides = [1, 1]} : vector<8x32xf32> to vector<8x8xf32>
    %34 = vector.extract_strided_slice %31 {offsets = [0, 0], sizes = [8, 8], strides = [1, 1]} : vector<8x32xf32> to vector<8x8xf32>
    %35 = vector.extract_strided_slice %32 {offsets = [0, 0], sizes = [8, 8], strides = [1, 1]} : vector<8x32xf32> to vector<8x8xf32>
    %cst_16 = arith.constant dense<0.000000e+00> : vector<8x8xf32>
    %36 = tpu.matmul %33, %34, %cst_16 {dimension_numbers = #tpu.dot_dimension_numbers<[1], [1], [0], [0], [0, 0, 1, 0], [], []>} : vector<8x8xf32>, vector<8x8xf32>, vector<8x8xf32> -> vector<8x8xf32>
    %cst_17 = arith.constant dense<0xFF800000> : vector<8xf32>
    %37 = vector.multi_reduction <maximumf>, %36, %cst_17 [1] : vector<8x8xf32> to vector<8xf32>
    %38 = vector.shape_cast %37 : vector<8xf32> to vector<8x1xf32>
    %39 = vector.broadcast %38 : vector<8x1xf32> to vector<8x8xf32>
    %40 = arith.subf %36, %39 : vector<8x8xf32>
    %41 = math.exp %40 : vector<8x8xf32>
    %cst_18 = arith.constant dense<0.000000e+00> : vector<8xf32>
    %42 = vector.multi_reduction <add>, %41, %cst_18 [1] : vector<8x8xf32> to vector<8xf32>
    %43 = vector.shape_cast %42 : vector<8xf32> to vector<8x1xf32>
    %44 = tpu.reciprocal %43 {approx = true} : vector<8x1xf32> -> vector<8x1xf32>
    %45 = vector.broadcast %44 : vector<8x1xf32> to vector<8x8xf32>
    %46 = arith.mulf %41, %45 : vector<8x8xf32>
    %cst_19 = arith.constant dense<0.000000e+00> : vector<8x8xf32>
    %47 = tpu.matmul %46, %35, %cst_19 {dimension_numbers = #tpu.dot_dimension_numbers<[1], [0], [0], [1], [0, 0, 1, 1], [], []>} : vector<8x8xf32>, vector<8x8xf32>, vector<8x8xf32> -> vector<8x8xf32>
    %48 = vector.extract_strided_slice %30 {offsets = [0, 8], sizes = [8, 8], strides = [1, 1]} : vector<8x32xf32> to vector<8x8xf32>
    %49 = vector.extract_strided_slice %31 {offsets = [0, 8], sizes = [8, 8], strides = [1, 1]} : vector<8x32xf32> to vector<8x8xf32>
    %50 = vector.extract_strided_slice %32 {offsets = [0, 8], sizes = [8, 8], strides = [1, 1]} : vector<8x32xf32> to vector<8x8xf32>
    %cst_20 = arith.constant dense<0.000000e+00> : vector<8x8xf32>
    %51 = tpu.matmul %48, %49, %cst_20 {dimension_numbers = #tpu.dot_dimension_numbers<[1], [1], [0], [0], [0, 0, 1, 0], [], []>} : vector<8x8xf32>, vector<8x8xf32>, vector<8x8xf32> -> vector<8x8xf32>
    %cst_21 = arith.constant dense<0xFF800000> : vector<8xf32>
    %52 = vector.multi_reduction <maximumf>, %51, %cst_21 [1] : vector<8x8xf32> to vector<8xf32>
    %53 = vector.shape_cast %52 : vector<8xf32> to vector<8x1xf32>
    %54 = vector.broadcast %53 : vector<8x1xf32> to vector<8x8xf32>
    %55 = arith.subf %51, %54 : vector<8x8xf32>
    %56 = math.exp %55 : vector<8x8xf32>
    %cst_22 = arith.constant dense<0.000000e+00> : vector<8xf32>
    %57 = vector.multi_reduction <add>, %56, %cst_22 [1] : vector<8x8xf32> to vector<8xf32>
    %58 = vector.shape_cast %57 : vector<8xf32> to vector<8x1xf32>
    %59 = tpu.reciprocal %58 {approx = true} : vector<8x1xf32> -> vector<8x1xf32>
    %60 = vector.broadcast %59 : vector<8x1xf32> to vector<8x8xf32>
    %61 = arith.mulf %56, %60 : vector<8x8xf32>
    %cst_23 = arith.constant dense<0.000000e+00> : vector<8x8xf32>
    %62 = tpu.matmul %61, %50, %cst_23 {dimension_numbers = #tpu.dot_dimension_numbers<[1], [0], [0], [1], [0, 0, 1, 1], [], []>} : vector<8x8xf32>, vector<8x8xf32>, vector<8x8xf32> -> vector<8x8xf32>
    %63 = vector.extract_strided_slice %30 {offsets = [0, 16], sizes = [8, 8], strides = [1, 1]} : vector<8x32xf32> to vector<8x8xf32>
    %64 = vector.extract_strided_slice %31 {offsets = [0, 16], sizes = [8, 8], strides = [1, 1]} : vector<8x32xf32> to vector<8x8xf32>
    %65 = vector.extract_strided_slice %32 {offsets = [0, 16], sizes = [8, 8], strides = [1, 1]} : vector<8x32xf32> to vector<8x8xf32>
    %cst_24 = arith.constant dense<0.000000e+00> : vector<8x8xf32>
    %66 = tpu.matmul %63, %64, %cst_24 {dimension_numbers = #tpu.dot_dimension_numbers<[1], [1], [0], [0], [0, 0, 1, 0], [], []>} : vector<8x8xf32>, vector<8x8xf32>, vector<8x8xf32> -> vector<8x8xf32>
    %cst_25 = arith.constant dense<0xFF800000> : vector<8xf32>
    %67 = vector.multi_reduction <maximumf>, %66, %cst_25 [1] : vector<8x8xf32> to vector<8xf32>
    %68 = vector.shape_cast %67 : vector<8xf32> to vector<8x1xf32>
    %69 = vector.broadcast %68 : vector<8x1xf32> to vector<8x8xf32>
    %70 = arith.subf %66, %69 : vector<8x8xf32>
    %71 = math.exp %70 : vector<8x8xf32>
    %cst_26 = arith.constant dense<0.000000e+00> : vector<8xf32>
    %72 = vector.multi_reduction <add>, %71, %cst_26 [1] : vector<8x8xf32> to vector<8xf32>
    %73 = vector.shape_cast %72 : vector<8xf32> to vector<8x1xf32>
    %74 = tpu.reciprocal %73 {approx = true} : vector<8x1xf32> -> vector<8x1xf32>
    %75 = vector.broadcast %74 : vector<8x1xf32> to vector<8x8xf32>
    %76 = arith.mulf %71, %75 : vector<8x8xf32>
    %cst_27 = arith.constant dense<0.000000e+00> : vector<8x8xf32>
    %77 = tpu.matmul %76, %65, %cst_27 {dimension_numbers = #tpu.dot_dimension_numbers<[1], [0], [0], [1], [0, 0, 1, 1], [], []>} : vector<8x8xf32>, vector<8x8xf32>, vector<8x8xf32> -> vector<8x8xf32>
    %78 = vector.extract_strided_slice %30 {offsets = [0, 24], sizes = [8, 8], strides = [1, 1]} : vector<8x32xf32> to vector<8x8xf32>
    %79 = vector.extract_strided_slice %31 {offsets = [0, 24], sizes = [8, 8], strides = [1, 1]} : vector<8x32xf32> to vector<8x8xf32>
    %80 = vector.extract_strided_slice %32 {offsets = [0, 24], sizes = [8, 8], strides = [1, 1]} : vector<8x32xf32> to vector<8x8xf32>
    %cst_28 = arith.constant dense<0.000000e+00> : vector<8x8xf32>
    %81 = tpu.matmul %78, %79, %cst_28 {dimension_numbers = #tpu.dot_dimension_numbers<[1], [1], [0], [0], [0, 0, 1, 0], [], []>} : vector<8x8xf32>, vector<8x8xf32>, vector<8x8xf32> -> vector<8x8xf32>
    %cst_29 = arith.constant dense<0xFF800000> : vector<8xf32>
    %82 = vector.multi_reduction <maximumf>, %81, %cst_29 [1] : vector<8x8xf32> to vector<8xf32>
    %83 = vector.shape_cast %82 : vector<8xf32> to vector<8x1xf32>
    %84 = vector.broadcast %83 : vector<8x1xf32> to vector<8x8xf32>
    %85 = arith.subf %81, %84 : vector<8x8xf32>
    %86 = math.exp %85 : vector<8x8xf32>
    %cst_30 = arith.constant dense<0.000000e+00> : vector<8xf32>
    %87 = vector.multi_reduction <add>, %86, %cst_30 [1] : vector<8x8xf32> to vector<8xf32>
    %88 = vector.shape_cast %87 : vector<8xf32> to vector<8x1xf32>
    %89 = tpu.reciprocal %88 {approx = true} : vector<8x1xf32> -> vector<8x1xf32>
    %90 = vector.broadcast %89 : vector<8x1xf32> to vector<8x8xf32>
    %91 = arith.mulf %86, %90 : vector<8x8xf32>
    %cst_31 = arith.constant dense<0.000000e+00> : vector<8x8xf32>
    %92 = tpu.matmul %91, %80, %cst_31 {dimension_numbers = #tpu.dot_dimension_numbers<[1], [0], [0], [1], [0, 0, 1, 1], [], []>} : vector<8x8xf32>, vector<8x8xf32>, vector<8x8xf32> -> vector<8x8xf32>
    %93 = tpu.concatenate %47, %62, %77, %92 in 1 : vector<8x8xf32>, vector<8x8xf32>, vector<8x8xf32>, vector<8x8xf32> -> vector<8x32xf32>
    %c0_32 = arith.constant 0 : index
    %c0_33 = arith.constant 0 : index
    %c0_34 = arith.constant 0 : index
    %94 = vector.load %arg5[%c0_32, %c0_33, %c0_34] : memref<2x32x32xf32, #tpu.memory_space<vmem>>, vector<1x32x32xf32>
    %95 = vector.shape_cast %94 : vector<1x32x32xf32> to vector<32x32xf32>
    %cst_35 = arith.constant dense<0.000000e+00> : vector<8x32xf32>
    %96 = tpu.matmul %93, %95, %cst_35 {dimension_numbers = #tpu.dot_dimension_numbers<[1], [0], [0], [1], [0, 0, 1, 1], [], []>} : vector<8x32xf32>, vector<32x32xf32>, vector<8x32xf32> -> vector<8x32xf32>
    %c0_36 = arith.constant 0 : index
    %c0_37 = arith.constant 0 : index
    %c0_38 = arith.constant 0 : index
    %97 = vector.load %arg6[%c0_36, %c0_37, %c0_38] : memref<2x1x32xf32, #tpu.memory_space<vmem>>, vector<1x1x32xf32>
    %98 = vector.shape_cast %97 : vector<1x1x32xf32> to vector<1x32xf32>
    %99 = vector.broadcast %98 : vector<1x32xf32> to vector<8x32xf32>
    %100 = arith.addf %96, %99 : vector<8x32xf32>
    %101 = arith.addf %100, %22 : vector<8x32xf32>
    %c0_39 = arith.constant 0 : index
    %c0_40 = arith.constant 0 : index
    %c0_41 = arith.constant 0 : index
    %102 = vector.load %arg7[%c0_39, %c0_40, %c0_41] : memref<2x1x32xf32, #tpu.memory_space<vmem>>, vector<1x1x32xf32>
    %103 = vector.shape_cast %102 : vector<1x1x32xf32> to vector<1x32xf32>
    %c0_42 = arith.constant 0 : index
    %c0_43 = arith.constant 0 : index
    %c0_44 = arith.constant 0 : index
    %104 = vector.load %arg8[%c0_42, %c0_43, %c0_44] : memref<2x1x32xf32, #tpu.memory_space<vmem>>, vector<1x1x32xf32>
    %105 = vector.shape_cast %104 : vector<1x1x32xf32> to vector<1x32xf32>
    %cst_45 = arith.constant dense<0.000000e+00> : vector<8xf32>
    %106 = vector.multi_reduction <add>, %101, %cst_45 [1] : vector<8x32xf32> to vector<8xf32>
    %107 = vector.shape_cast %106 : vector<8xf32> to vector<8x1xf32>
    %cst_46 = arith.constant 3.200000e+01 : f32
    %108 = vector.broadcast %cst_46 : f32 to vector<8x1xf32>
    %109 = arith.divf %107, %108 : vector<8x1xf32>
    %110 = vector.broadcast %109 : vector<8x1xf32> to vector<8x32xf32>
    %111 = arith.subf %101, %110 : vector<8x32xf32>
    %112 = arith.mulf %111, %111 : vector<8x32xf32>
    %cst_47 = arith.constant dense<0.000000e+00> : vector<8xf32>
    %113 = vector.multi_reduction <add>, %112, %cst_47 [1] : vector<8x32xf32> to vector<8xf32>
    %114 = vector.shape_cast %113 : vector<8xf32> to vector<8x1xf32>
    %cst_48 = arith.constant 3.200000e+01 : f32
    %115 = vector.broadcast %cst_48 : f32 to vector<8x1xf32>
    %116 = arith.divf %114, %115 : vector<8x1xf32>
    %cst_49 = arith.constant 9.99999996E-13 : f32
    %117 = vector.broadcast %cst_49 : f32 to vector<8x1xf32>
    %118 = arith.addf %116, %117 : vector<8x1xf32>
    %119 = math.rsqrt %118 : vector<8x1xf32>
    %120 = vector.broadcast %119 : vector<8x1xf32> to vector<8x32xf32>
    %121 = arith.mulf %111, %120 : vector<8x32xf32>
    %122 = vector.broadcast %103 : vector<1x32xf32> to vector<8x32xf32>
    %123 = arith.mulf %121, %122 : vector<8x32xf32>
    %124 = vector.broadcast %105 : vector<1x32xf32> to vector<8x32xf32>
    %125 = arith.addf %123, %124 : vector<8x32xf32>
    %c0_50 = arith.constant 0 : index
    %c0_51 = arith.constant 0 : index
    %c0_52 = arith.constant 0 : index
    %126 = vector.load %arg9[%c0_50, %c0_51, %c0_52] : memref<2x32x128xf32, #tpu.memory_space<vmem>>, vector<1x32x128xf32>
    %127 = vector.shape_cast %126 : vector<1x32x128xf32> to vector<32x128xf32>
    %cst_53 = arith.constant dense<0.000000e+00> : vector<8x128xf32>
    %128 = tpu.matmul %125, %127, %cst_53 {dimension_numbers = #tpu.dot_dimension_numbers<[1], [0], [0], [1], [0, 0, 1, 1], [], []>} : vector<8x32xf32>, vector<32x128xf32>, vector<8x128xf32> -> vector<8x128xf32>
    %c0_54 = arith.constant 0 : index
    %c0_55 = arith.constant 0 : index
    %c0_56 = arith.constant 0 : index
    %129 = vector.load %arg10[%c0_54, %c0_55, %c0_56] : memref<2x1x128xf32, #tpu.memory_space<vmem>>, vector<1x1x128xf32>
    %130 = vector.shape_cast %129 : vector<1x1x128xf32> to vector<1x128xf32>
    %131 = vector.broadcast %130 : vector<1x128xf32> to vector<8x128xf32>
    %132 = arith.addf %128, %131 : vector<8x128xf32>
    %cst_57 = arith.constant 5.000000e-01 : f32
    %133 = vector.broadcast %cst_57 : f32 to vector<8x128xf32>
    %134 = arith.mulf %133, %132 : vector<8x128xf32>
    %cst_58 = arith.constant 0.707106769 : f32
    %135 = vector.broadcast %cst_58 : f32 to vector<8x128xf32>
    %136 = arith.mulf %132, %135 : vector<8x128xf32>
    %137 = math.erf %136 : vector<8x128xf32>
    %cst_59 = arith.constant 1.000000e+00 : f32
    %138 = vector.broadcast %cst_59 : f32 to vector<8x128xf32>
    %139 = arith.addf %138, %137 : vector<8x128xf32>
    %140 = arith.mulf %134, %139 : vector<8x128xf32>
    %c0_60 = arith.constant 0 : index
    %c0_61 = arith.constant 0 : index
    %c0_62 = arith.constant 0 : index
    %141 = vector.load %arg11[%c0_60, %c0_61, %c0_62] : memref<2x128x32xf32, #tpu.memory_space<vmem>>, vector<1x128x32xf32>
    %142 = vector.shape_cast %141 : vector<1x128x32xf32> to vector<128x32xf32>
    %cst_63 = arith.constant dense<0.000000e+00> : vector<8x32xf32>
    %143 = tpu.matmul %140, %142, %cst_63 {dimension_numbers = #tpu.dot_dimension_numbers<[1], [0], [0], [1], [0, 0, 1, 1], [], []>} : vector<8x128xf32>, vector<128x32xf32>, vector<8x32xf32> -> vector<8x32xf32>
    %c0_64 = arith.constant 0 : index
    %c0_65 = arith.constant 0 : index
    %c0_66 = arith.constant 0 : index
    %144 = vector.load %arg12[%c0_64, %c0_65, %c0_66] : memref<2x1x32xf32, #tpu.memory_space<vmem>>, vector<1x1x32xf32>
    %145 = vector.shape_cast %144 : vector<1x1x32xf32> to vector<1x32xf32>
    %146 = vector.broadcast %145 : vector<1x32xf32> to vector<8x32xf32>
    %147 = arith.addf %143, %146 : vector<8x32xf32>
    %148 = arith.addf %147, %125 : vector<8x32xf32>
    %c0_67 = arith.constant 0 : index
    %c0_68 = arith.constant 0 : index
    %c0_69 = arith.constant 0 : index
    %149 = vector.load %arg13[%c0_67, %c0_68, %c0_69] : memref<2x1x32xf32, #tpu.memory_space<vmem>>, vector<1x1x32xf32>
    %150 = vector.shape_cast %149 : vector<1x1x32xf32> to vector<1x32xf32>
    %c0_70 = arith.constant 0 : index
    %c0_71 = arith.constant 0 : index
    %c0_72 = arith.constant 0 : index
    %151 = vector.load %arg14[%c0_70, %c0_71, %c0_72] : memref<2x1x32xf32, #tpu.memory_space<vmem>>, vector<1x1x32xf32>
    %152 = vector.shape_cast %151 : vector<1x1x32xf32> to vector<1x32xf32>
    %cst_73 = arith.constant dense<0.000000e+00> : vector<8xf32>
    %153 = vector.multi_reduction <add>, %148, %cst_73 [1] : vector<8x32xf32> to vector<8xf32>
    %154 = vector.shape_cast %153 : vector<8xf32> to vector<8x1xf32>
    %cst_74 = arith.constant 3.200000e+01 : f32
    %155 = vector.broadcast %cst_74 : f32 to vector<8x1xf32>
    %156 = arith.divf %154, %155 : vector<8x1xf32>
    %157 = vector.broadcast %156 : vector<8x1xf32> to vector<8x32xf32>
    %158 = arith.subf %148, %157 : vector<8x32xf32>
    %159 = arith.mulf %158, %158 : vector<8x32xf32>
    %cst_75 = arith.constant dense<0.000000e+00> : vector<8xf32>
    %160 = vector.multi_reduction <add>, %159, %cst_75 [1] : vector<8x32xf32> to vector<8xf32>
    %161 = vector.shape_cast %160 : vector<8xf32> to vector<8x1xf32>
    %cst_76 = arith.constant 3.200000e+01 : f32
    %162 = vector.broadcast %cst_76 : f32 to vector<8x1xf32>
    %163 = arith.divf %161, %162 : vector<8x1xf32>
    %cst_77 = arith.constant 9.99999996E-13 : f32
    %164 = vector.broadcast %cst_77 : f32 to vector<8x1xf32>
    %165 = arith.addf %163, %164 : vector<8x1xf32>
    %166 = math.rsqrt %165 : vector<8x1xf32>
    %167 = vector.broadcast %166 : vector<8x1xf32> to vector<8x32xf32>
    %168 = arith.mulf %158, %167 : vector<8x32xf32>
    %169 = vector.broadcast %150 : vector<1x32xf32> to vector<8x32xf32>
    %170 = arith.mulf %168, %169 : vector<8x32xf32>
    %171 = vector.broadcast %152 : vector<1x32xf32> to vector<8x32xf32>
    %172 = arith.addf %170, %171 : vector<8x32xf32>
    %c1 = arith.constant 1 : index
    %c0_78 = arith.constant 0 : index
    %c0_79 = arith.constant 0 : index
    %173 = vector.load %arg3[%c1, %c0_78, %c0_79] : memref<2x32x96xf32, #tpu.memory_space<vmem>>, vector<1x32x96xf32>
    %174 = vector.shape_cast %173 : vector<1x32x96xf32> to vector<32x96xf32>
    %cst_80 = arith.constant dense<0.000000e+00> : vector<8x96xf32>
    %175 = tpu.matmul %172, %174, %cst_80 {dimension_numbers = #tpu.dot_dimension_numbers<[1], [0], [0], [1], [0, 0, 1, 1], [], []>} : vector<8x32xf32>, vector<32x96xf32>, vector<8x96xf32> -> vector<8x96xf32>
    %c1_81 = arith.constant 1 : index
    %c0_82 = arith.constant 0 : index
    %c0_83 = arith.constant 0 : index
    %176 = vector.load %arg4[%c1_81, %c0_82, %c0_83] : memref<2x1x96xf32, #tpu.memory_space<vmem>>, vector<1x1x96xf32>
    %177 = vector.shape_cast %176 : vector<1x1x96xf32> to vector<1x96xf32>
    %178 = vector.broadcast %177 : vector<1x96xf32> to vector<8x96xf32>
    %179 = arith.addf %175, %178 : vector<8x96xf32>
    %180 = vector.extract_strided_slice %179 {offsets = [0, 0], sizes = [8, 32], strides = [1, 1]} : vector<8x96xf32> to vector<8x32xf32>
    %181 = vector.extract_strided_slice %179 {offsets = [0, 32], sizes = [8, 32], strides = [1, 1]} : vector<8x96xf32> to vector<8x32xf32>
    %182 = vector.extract_strided_slice %179 {offsets = [0, 64], sizes = [8, 32], strides = [1, 1]} : vector<8x96xf32> to vector<8x32xf32>
    %183 = vector.extract_strided_slice %180 {offsets = [0, 0], sizes = [8, 8], strides = [1, 1]} : vector<8x32xf32> to vector<8x8xf32>
    %184 = vector.extract_strided_slice %181 {offsets = [0, 0], sizes = [8, 8], strides = [1, 1]} : vector<8x32xf32> to vector<8x8xf32>
    %185 = vector.extract_strided_slice %182 {offsets = [0, 0], sizes = [8, 8], strides = [1, 1]} : vector<8x32xf32> to vector<8x8xf32>
    %cst_84 = arith.constant dense<0.000000e+00> : vector<8x8xf32>
    %186 = tpu.matmul %183, %184, %cst_84 {dimension_numbers = #tpu.dot_dimension_numbers<[1], [1], [0], [0], [0, 0, 1, 0], [], []>} : vector<8x8xf32>, vector<8x8xf32>, vector<8x8xf32> -> vector<8x8xf32>
    %cst_85 = arith.constant dense<0xFF800000> : vector<8xf32>
    %187 = vector.multi_reduction <maximumf>, %186, %cst_85 [1] : vector<8x8xf32> to vector<8xf32>
    %188 = vector.shape_cast %187 : vector<8xf32> to vector<8x1xf32>
    %189 = vector.broadcast %188 : vector<8x1xf32> to vector<8x8xf32>
    %190 = arith.subf %186, %189 : vector<8x8xf32>
    %191 = math.exp %190 : vector<8x8xf32>
    %cst_86 = arith.constant dense<0.000000e+00> : vector<8xf32>
    %192 = vector.multi_reduction <add>, %191, %cst_86 [1] : vector<8x8xf32> to vector<8xf32>
    %193 = vector.shape_cast %192 : vector<8xf32> to vector<8x1xf32>
    %194 = tpu.reciprocal %193 {approx = true} : vector<8x1xf32> -> vector<8x1xf32>
    %195 = vector.broadcast %194 : vector<8x1xf32> to vector<8x8xf32>
    %196 = arith.mulf %191, %195 : vector<8x8xf32>
    %cst_87 = arith.constant dense<0.000000e+00> : vector<8x8xf32>
    %197 = tpu.matmul %196, %185, %cst_87 {dimension_numbers = #tpu.dot_dimension_numbers<[1], [0], [0], [1], [0, 0, 1, 1], [], []>} : vector<8x8xf32>, vector<8x8xf32>, vector<8x8xf32> -> vector<8x8xf32>
    %198 = vector.extract_strided_slice %180 {offsets = [0, 8], sizes = [8, 8], strides = [1, 1]} : vector<8x32xf32> to vector<8x8xf32>
    %199 = vector.extract_strided_slice %181 {offsets = [0, 8], sizes = [8, 8], strides = [1, 1]} : vector<8x32xf32> to vector<8x8xf32>
    %200 = vector.extract_strided_slice %182 {offsets = [0, 8], sizes = [8, 8], strides = [1, 1]} : vector<8x32xf32> to vector<8x8xf32>
    %cst_88 = arith.constant dense<0.000000e+00> : vector<8x8xf32>
    %201 = tpu.matmul %198, %199, %cst_88 {dimension_numbers = #tpu.dot_dimension_numbers<[1], [1], [0], [0], [0, 0, 1, 0], [], []>} : vector<8x8xf32>, vector<8x8xf32>, vector<8x8xf32> -> vector<8x8xf32>
    %cst_89 = arith.constant dense<0xFF800000> : vector<8xf32>
    %202 = vector.multi_reduction <maximumf>, %201, %cst_89 [1] : vector<8x8xf32> to vector<8xf32>
    %203 = vector.shape_cast %202 : vector<8xf32> to vector<8x1xf32>
    %204 = vector.broadcast %203 : vector<8x1xf32> to vector<8x8xf32>
    %205 = arith.subf %201, %204 : vector<8x8xf32>
    %206 = math.exp %205 : vector<8x8xf32>
    %cst_90 = arith.constant dense<0.000000e+00> : vector<8xf32>
    %207 = vector.multi_reduction <add>, %206, %cst_90 [1] : vector<8x8xf32> to vector<8xf32>
    %208 = vector.shape_cast %207 : vector<8xf32> to vector<8x1xf32>
    %209 = tpu.reciprocal %208 {approx = true} : vector<8x1xf32> -> vector<8x1xf32>
    %210 = vector.broadcast %209 : vector<8x1xf32> to vector<8x8xf32>
    %211 = arith.mulf %206, %210 : vector<8x8xf32>
    %cst_91 = arith.constant dense<0.000000e+00> : vector<8x8xf32>
    %212 = tpu.matmul %211, %200, %cst_91 {dimension_numbers = #tpu.dot_dimension_numbers<[1], [0], [0], [1], [0, 0, 1, 1], [], []>} : vector<8x8xf32>, vector<8x8xf32>, vector<8x8xf32> -> vector<8x8xf32>
    %213 = vector.extract_strided_slice %180 {offsets = [0, 16], sizes = [8, 8], strides = [1, 1]} : vector<8x32xf32> to vector<8x8xf32>
    %214 = vector.extract_strided_slice %181 {offsets = [0, 16], sizes = [8, 8], strides = [1, 1]} : vector<8x32xf32> to vector<8x8xf32>
    %215 = vector.extract_strided_slice %182 {offsets = [0, 16], sizes = [8, 8], strides = [1, 1]} : vector<8x32xf32> to vector<8x8xf32>
    %cst_92 = arith.constant dense<0.000000e+00> : vector<8x8xf32>
    %216 = tpu.matmul %213, %214, %cst_92 {dimension_numbers = #tpu.dot_dimension_numbers<[1], [1], [0], [0], [0, 0, 1, 0], [], []>} : vector<8x8xf32>, vector<8x8xf32>, vector<8x8xf32> -> vector<8x8xf32>
    %cst_93 = arith.constant dense<0xFF800000> : vector<8xf32>
    %217 = vector.multi_reduction <maximumf>, %216, %cst_93 [1] : vector<8x8xf32> to vector<8xf32>
    %218 = vector.shape_cast %217 : vector<8xf32> to vector<8x1xf32>
    %219 = vector.broadcast %218 : vector<8x1xf32> to vector<8x8xf32>
    %220 = arith.subf %216, %219 : vector<8x8xf32>
    %221 = math.exp %220 : vector<8x8xf32>
    %cst_94 = arith.constant dense<0.000000e+00> : vector<8xf32>
    %222 = vector.multi_reduction <add>, %221, %cst_94 [1] : vector<8x8xf32> to vector<8xf32>
    %223 = vector.shape_cast %222 : vector<8xf32> to vector<8x1xf32>
    %224 = tpu.reciprocal %223 {approx = true} : vector<8x1xf32> -> vector<8x1xf32>
    %225 = vector.broadcast %224 : vector<8x1xf32> to vector<8x8xf32>
    %226 = arith.mulf %221, %225 : vector<8x8xf32>
    %cst_95 = arith.constant dense<0.000000e+00> : vector<8x8xf32>
    %227 = tpu.matmul %226, %215, %cst_95 {dimension_numbers = #tpu.dot_dimension_numbers<[1], [0], [0], [1], [0, 0, 1, 1], [], []>} : vector<8x8xf32>, vector<8x8xf32>, vector<8x8xf32> -> vector<8x8xf32>
    %228 = vector.extract_strided_slice %180 {offsets = [0, 24], sizes = [8, 8], strides = [1, 1]} : vector<8x32xf32> to vector<8x8xf32>
    %229 = vector.extract_strided_slice %181 {offsets = [0, 24], sizes = [8, 8], strides = [1, 1]} : vector<8x32xf32> to vector<8x8xf32>
    %230 = vector.extract_strided_slice %182 {offsets = [0, 24], sizes = [8, 8], strides = [1, 1]} : vector<8x32xf32> to vector<8x8xf32>
    %cst_96 = arith.constant dense<0.000000e+00> : vector<8x8xf32>
    %231 = tpu.matmul %228, %229, %cst_96 {dimension_numbers = #tpu.dot_dimension_numbers<[1], [1], [0], [0], [0, 0, 1, 0], [], []>} : vector<8x8xf32>, vector<8x8xf32>, vector<8x8xf32> -> vector<8x8xf32>
    %cst_97 = arith.constant dense<0xFF800000> : vector<8xf32>
    %232 = vector.multi_reduction <maximumf>, %231, %cst_97 [1] : vector<8x8xf32> to vector<8xf32>
    %233 = vector.shape_cast %232 : vector<8xf32> to vector<8x1xf32>
    %234 = vector.broadcast %233 : vector<8x1xf32> to vector<8x8xf32>
    %235 = arith.subf %231, %234 : vector<8x8xf32>
    %236 = math.exp %235 : vector<8x8xf32>
    %cst_98 = arith.constant dense<0.000000e+00> : vector<8xf32>
    %237 = vector.multi_reduction <add>, %236, %cst_98 [1] : vector<8x8xf32> to vector<8xf32>
    %238 = vector.shape_cast %237 : vector<8xf32> to vector<8x1xf32>
    %239 = tpu.reciprocal %238 {approx = true} : vector<8x1xf32> -> vector<8x1xf32>
    %240 = vector.broadcast %239 : vector<8x1xf32> to vector<8x8xf32>
    %241 = arith.mulf %236, %240 : vector<8x8xf32>
    %cst_99 = arith.constant dense<0.000000e+00> : vector<8x8xf32>
    %242 = tpu.matmul %241, %230, %cst_99 {dimension_numbers = #tpu.dot_dimension_numbers<[1], [0], [0], [1], [0, 0, 1, 1], [], []>} : vector<8x8xf32>, vector<8x8xf32>, vector<8x8xf32> -> vector<8x8xf32>
    %243 = tpu.concatenate %197, %212, %227, %242 in 1 : vector<8x8xf32>, vector<8x8xf32>, vector<8x8xf32>, vector<8x8xf32> -> vector<8x32xf32>
    %c1_100 = arith.constant 1 : index
    %c0_101 = arith.constant 0 : index
    %c0_102 = arith.constant 0 : index
    %244 = vector.load %arg5[%c1_100, %c0_101, %c0_102] : memref<2x32x32xf32, #tpu.memory_space<vmem>>, vector<1x32x32xf32>
    %245 = vector.shape_cast %244 : vector<1x32x32xf32> to vector<32x32xf32>
    %cst_103 = arith.constant dense<0.000000e+00> : vector<8x32xf32>
    %246 = tpu.matmul %243, %245, %cst_103 {dimension_numbers = #tpu.dot_dimension_numbers<[1], [0], [0], [1], [0, 0, 1, 1], [], []>} : vector<8x32xf32>, vector<32x32xf32>, vector<8x32xf32> -> vector<8x32xf32>
    %c1_104 = arith.constant 1 : index
    %c0_105 = arith.constant 0 : index
    %c0_106 = arith.constant 0 : index
    %247 = vector.load %arg6[%c1_104, %c0_105, %c0_106] : memref<2x1x32xf32, #tpu.memory_space<vmem>>, vector<1x1x32xf32>
    %248 = vector.shape_cast %247 : vector<1x1x32xf32> to vector<1x32xf32>
    %249 = vector.broadcast %248 : vector<1x32xf32> to vector<8x32xf32>
    %250 = arith.addf %246, %249 : vector<8x32xf32>
    %251 = arith.addf %250, %172 : vector<8x32xf32>
    %c1_107 = arith.constant 1 : index
    %c0_108 = arith.constant 0 : index
    %c0_109 = arith.constant 0 : index
    %252 = vector.load %arg7[%c1_107, %c0_108, %c0_109] : memref<2x1x32xf32, #tpu.memory_space<vmem>>, vector<1x1x32xf32>
    %253 = vector.shape_cast %252 : vector<1x1x32xf32> to vector<1x32xf32>
    %c1_110 = arith.constant 1 : index
    %c0_111 = arith.constant 0 : index
    %c0_112 = arith.constant 0 : index
    %254 = vector.load %arg8[%c1_110, %c0_111, %c0_112] : memref<2x1x32xf32, #tpu.memory_space<vmem>>, vector<1x1x32xf32>
    %255 = vector.shape_cast %254 : vector<1x1x32xf32> to vector<1x32xf32>
    %cst_113 = arith.constant dense<0.000000e+00> : vector<8xf32>
    %256 = vector.multi_reduction <add>, %251, %cst_113 [1] : vector<8x32xf32> to vector<8xf32>
    %257 = vector.shape_cast %256 : vector<8xf32> to vector<8x1xf32>
    %cst_114 = arith.constant 3.200000e+01 : f32
    %258 = vector.broadcast %cst_114 : f32 to vector<8x1xf32>
    %259 = arith.divf %257, %258 : vector<8x1xf32>
    %260 = vector.broadcast %259 : vector<8x1xf32> to vector<8x32xf32>
    %261 = arith.subf %251, %260 : vector<8x32xf32>
    %262 = arith.mulf %261, %261 : vector<8x32xf32>
    %cst_115 = arith.constant dense<0.000000e+00> : vector<8xf32>
    %263 = vector.multi_reduction <add>, %262, %cst_115 [1] : vector<8x32xf32> to vector<8xf32>
    %264 = vector.shape_cast %263 : vector<8xf32> to vector<8x1xf32>
    %cst_116 = arith.constant 3.200000e+01 : f32
    %265 = vector.broadcast %cst_116 : f32 to vector<8x1xf32>
    %266 = arith.divf %264, %265 : vector<8x1xf32>
    %cst_117 = arith.constant 9.99999996E-13 : f32
    %267 = vector.broadcast %cst_117 : f32 to vector<8x1xf32>
    %268 = arith.addf %266, %267 : vector<8x1xf32>
    %269 = math.rsqrt %268 : vector<8x1xf32>
    %270 = vector.broadcast %269 : vector<8x1xf32> to vector<8x32xf32>
    %271 = arith.mulf %261, %270 : vector<8x32xf32>
    %272 = vector.broadcast %253 : vector<1x32xf32> to vector<8x32xf32>
    %273 = arith.mulf %271, %272 : vector<8x32xf32>
    %274 = vector.broadcast %255 : vector<1x32xf32> to vector<8x32xf32>
    %275 = arith.addf %273, %274 : vector<8x32xf32>
    %c1_118 = arith.constant 1 : index
    %c0_119 = arith.constant 0 : index
    %c0_120 = arith.constant 0 : index
    %276 = vector.load %arg9[%c1_118, %c0_119, %c0_120] : memref<2x32x128xf32, #tpu.memory_space<vmem>>, vector<1x32x128xf32>
    %277 = vector.shape_cast %276 : vector<1x32x128xf32> to vector<32x128xf32>
    %cst_121 = arith.constant dense<0.000000e+00> : vector<8x128xf32>
    %278 = tpu.matmul %275, %277, %cst_121 {dimension_numbers = #tpu.dot_dimension_numbers<[1], [0], [0], [1], [0, 0, 1, 1], [], []>} : vector<8x32xf32>, vector<32x128xf32>, vector<8x128xf32> -> vector<8x128xf32>
    %c1_122 = arith.constant 1 : index
    %c0_123 = arith.constant 0 : index
    %c0_124 = arith.constant 0 : index
    %279 = vector.load %arg10[%c1_122, %c0_123, %c0_124] : memref<2x1x128xf32, #tpu.memory_space<vmem>>, vector<1x1x128xf32>
    %280 = vector.shape_cast %279 : vector<1x1x128xf32> to vector<1x128xf32>
    %281 = vector.broadcast %280 : vector<1x128xf32> to vector<8x128xf32>
    %282 = arith.addf %278, %281 : vector<8x128xf32>
    %cst_125 = arith.constant 5.000000e-01 : f32
    %283 = vector.broadcast %cst_125 : f32 to vector<8x128xf32>
    %284 = arith.mulf %283, %282 : vector<8x128xf32>
    %cst_126 = arith.constant 0.707106769 : f32
    %285 = vector.broadcast %cst_126 : f32 to vector<8x128xf32>
    %286 = arith.mulf %282, %285 : vector<8x128xf32>
    %287 = math.erf %286 : vector<8x128xf32>
    %cst_127 = arith.constant 1.000000e+00 : f32
    %288 = vector.broadcast %cst_127 : f32 to vector<8x128xf32>
    %289 = arith.addf %288, %287 : vector<8x128xf32>
    %290 = arith.mulf %284, %289 : vector<8x128xf32>
    %c1_128 = arith.constant 1 : index
    %c0_129 = arith.constant 0 : index
    %c0_130 = arith.constant 0 : index
    %291 = vector.load %arg11[%c1_128, %c0_129, %c0_130] : memref<2x128x32xf32, #tpu.memory_space<vmem>>, vector<1x128x32xf32>
    %292 = vector.shape_cast %291 : vector<1x128x32xf32> to vector<128x32xf32>
    %cst_131 = arith.constant dense<0.000000e+00> : vector<8x32xf32>
    %293 = tpu.matmul %290, %292, %cst_131 {dimension_numbers = #tpu.dot_dimension_numbers<[1], [0], [0], [1], [0, 0, 1, 1], [], []>} : vector<8x128xf32>, vector<128x32xf32>, vector<8x32xf32> -> vector<8x32xf32>
    %c1_132 = arith.constant 1 : index
    %c0_133 = arith.constant 0 : index
    %c0_134 = arith.constant 0 : index
    %294 = vector.load %arg12[%c1_132, %c0_133, %c0_134] : memref<2x1x32xf32, #tpu.memory_space<vmem>>, vector<1x1x32xf32>
    %295 = vector.shape_cast %294 : vector<1x1x32xf32> to vector<1x32xf32>
    %296 = vector.broadcast %295 : vector<1x32xf32> to vector<8x32xf32>
    %297 = arith.addf %293, %296 : vector<8x32xf32>
    %298 = arith.addf %297, %275 : vector<8x32xf32>
    %c1_135 = arith.constant 1 : index
    %c0_136 = arith.constant 0 : index
    %c0_137 = arith.constant 0 : index
    %299 = vector.load %arg13[%c1_135, %c0_136, %c0_137] : memref<2x1x32xf32, #tpu.memory_space<vmem>>, vector<1x1x32xf32>
    %300 = vector.shape_cast %299 : vector<1x1x32xf32> to vector<1x32xf32>
    %c1_138 = arith.constant 1 : index
    %c0_139 = arith.constant 0 : index
    %c0_140 = arith.constant 0 : index
    %301 = vector.load %arg14[%c1_138, %c0_139, %c0_140] : memref<2x1x32xf32, #tpu.memory_space<vmem>>, vector<1x1x32xf32>
    %302 = vector.shape_cast %301 : vector<1x1x32xf32> to vector<1x32xf32>
    %cst_141 = arith.constant dense<0.000000e+00> : vector<8xf32>
    %303 = vector.multi_reduction <add>, %298, %cst_141 [1] : vector<8x32xf32> to vector<8xf32>
    %304 = vector.shape_cast %303 : vector<8xf32> to vector<8x1xf32>
    %cst_142 = arith.constant 3.200000e+01 : f32
    %305 = vector.broadcast %cst_142 : f32 to vector<8x1xf32>
    %306 = arith.divf %304, %305 : vector<8x1xf32>
    %307 = vector.broadcast %306 : vector<8x1xf32> to vector<8x32xf32>
    %308 = arith.subf %298, %307 : vector<8x32xf32>
    %309 = arith.mulf %308, %308 : vector<8x32xf32>
    %cst_143 = arith.constant dense<0.000000e+00> : vector<8xf32>
    %310 = vector.multi_reduction <add>, %309, %cst_143 [1] : vector<8x32xf32> to vector<8xf32>
    %311 = vector.shape_cast %310 : vector<8xf32> to vector<8x1xf32>
    %cst_144 = arith.constant 3.200000e+01 : f32
    %312 = vector.broadcast %cst_144 : f32 to vector<8x1xf32>
    %313 = arith.divf %311, %312 : vector<8x1xf32>
    %cst_145 = arith.constant 9.99999996E-13 : f32
    %314 = vector.broadcast %cst_145 : f32 to vector<8x1xf32>
    %315 = arith.addf %313, %314 : vector<8x1xf32>
    %316 = math.rsqrt %315 : vector<8x1xf32>
    %317 = vector.broadcast %316 : vector<8x1xf32> to vector<8x32xf32>
    %318 = arith.mulf %308, %317 : vector<8x32xf32>
    %319 = vector.broadcast %300 : vector<1x32xf32> to vector<8x32xf32>
    %320 = arith.mulf %318, %319 : vector<8x32xf32>
    %321 = vector.broadcast %302 : vector<1x32xf32> to vector<8x32xf32>
    %322 = arith.addf %320, %321 : vector<8x32xf32>
    %c0_146 = arith.constant 0 : index
    %c0_147 = arith.constant 0 : index
    %323 = vector.load %arg15[%c0_146, %c0_147] : memref<8x32xf32, #tpu.memory_space<vmem>>, vector<8x32xf32>
    tpu.vector_store %arg15[%c0_146, %c0_147], %322 {strides = array<i32>} : memref<8x32xf32, #tpu.memory_space<vmem>>, vector<8x32xf32>,
    return
  }
}

</mosaic_0001>

<bundles_post_ra>
// kernel: bert_forward.1
= control target key start
LH: loop header
LB: loop body
LE: loop exit
PB: predicated region body
PF: predicated region fallthrough
CT: control target
= control target key end

     0   :  { %vm54_vm0 = vcmask 261120   ;;  %s3337_s0 = inlined_call_operand.vmem [shape: f32[8,32], index: 0, kind: input, shape index: {}]   ;;  %s3338_s1 = inlined_call_operand.vmem [shape: f32[1,32], index: 1, kind: input, shape index: {}]   ;;  %s3339_s2 = inlined_call_operand.vmem [shape: f32[1,32], index: 2, kind: input, shape index: {}]   ;;  %s3340_s3 = inlined_call_operand.vmem [shape: f32[2,32,96], index: 3, kind: input, shape index: {}]   ;;  %s3341_s4 = inlined_call_operand.vmem [shape: f32[2,1,96], index: 4, kind: input, shape index: {}]   ;;  %s3342_s5 = inlined_call_operand.vmem [shape: f32[2,32,32], index: 5, kind: input, shape index: {}]   ;;  %s3343_s6 = inlined_call_operand.vmem [shape: f32[2,1,32], index: 6, kind: input, shape index: {}]   ;;  %s3344_s7 = inlined_call_operand.vmem [shape: f32[2,1,32], index: 7, kind: input, shape index: {}]   ;;  %s3345_s8 = inlined_call_operand.vmem [shape: f32[2,1,32], index: 8, kind: input, shape index: {}]   ;;  %s3346_s9 = inlined_call_operand.vmem [shape: f32[2,32,128], index: 9, kind: input, shape index: {}]   ;;  %s3347_s10 = inlined_call_operand.vmem [shape: f32[2,1,128], index: 10, kind: input, shape index: {}]   ;;  %s3348_s11 = inlined_call_operand.vmem [shape: f32[2,128,32], index: 11, kind: input, shape index: {}]   ;;  %s3349_s12 = inlined_call_operand.vmem [shape: f32[2,1,32], index: 12, kind: input, shape index: {}]   ;;  %s3350_s13 = inlined_call_operand.vmem [shape: f32[2,1,32], index: 13, kind: input, shape index: {}]   ;;  %s3351_s14 = inlined_call_operand.vmem [shape: f32[2,1,32], index: 14, kind: input, shape index: {}]   ;;  %s3352_s15 = inlined_call_operand.hbm [shape: f32[8,32], index: 15, kind: output, shape index: {}]  }
   0x1   :  { %v51_v0 = vld [vmem:[%s3337_s0] sm:$0xff] }
   0x2   :  { %20 = vsyncpa [#allocation3], 0  ;;  %v55_v1 = vsel %vm54_vm0, %v51_v0, 0.0  ;;  %v86_v7 = vld [vmem:[%s3340_s3 + $0x18] sm:$0xff]  ;;  %v2762_v8 = vmov 0.0   ;;  %v85_v9 = vld [vmem:[%s3340_s3 + $0x10] sm:$0xff] }
   0x3   :  { %56 = vadd.xlane.f32.xlu0 %v55_v1  ;;  %2461 = vmatprep.subr.mxu1 %v2762_v8  ;;  %vm2763_vm1 = vmmov 0   ;;  %v84_v10 = vld [vmem:[%s3340_s3 + $0x8] sm:$0xff]  ;;  %v83_v11 = vld [vmem:[%s3340_s3] sm:$0xff]  ;;  %s2766_s18 = smov 88   ;;  %s2767_s19 = smov 80   ;;  %vm170_vm2 = vcmask 64512  }
   0x4   :  { %2469 = vmatprep.mubr.msk.f32.mxu1 %vm2763_vm1, %v2762_v8  ;;  %2462 = vmatpush3.msra.mxu1 %v86_v7  ;;  %v2281_v16 = vld [vmem:[%s3338_s1] ss:$0 sm:$0xff]  ;;  %s2764_s1 = smov 120   ;;  %s2768_s20 = smov 112   ;;  %vm840_vm3 = vcmask 130048   ;;  %vm842_vm4 = vcmask 195584  }
   0x5   :  { %2482 = vmatprep.subr.mxu0 %v2762_v8  ;;  %2463 = vmatprep.subr.mxu1 %v2762_v8  ;;  %v2282_v18 = vld [vmem:[%s3339_s2] ss:$0 sm:$0xff]  ;;  %s2765_s2 = smov 96   ;;  %s2769_s21 = smov 72  }
   0x6   :  { %2484 = vmatprep.mubr.msk.f32.mxu0 %vm2763_vm1, %v2762_v8  ;;  %2464 = vmatpush3.msra.mxu1 %v85_v9  ;;  %v2283_v21 = vld [vmem:[%s3341_s4] ss:$0 sm:$0xff]  ;;  %s2770_s0 = smov 104   ;;  %s2771_s22 = smov 64  }
   0x7   :  { %2465 = vmatprep.subr.mxu1 %v2762_v8  ;;  %s2772_s23 = smov 48   ;;  %s3355_s24 = smov 40  }
   0x8   :  { %2466 = vmatpush3.msra.mxu1 %v84_v10  ;;  %s2774_s25 = smov 56   ;;  %s3356_s27 = smov 8  }
   0x9   :  { %2467 = vmatprep.subr.mxu1 %v2762_v8  ;;  %s3354_s28 = smov 16   ;;  %s3353_s29 = smov 24  }
   0xa   :  { %2468 = vmatpush3.msra.mxu1 %v83_v11 }
   0xb   :  { %2472 = vmatprep.subr.mxu1 %v2762_v8 }
  0x8c   :  { %v57_v2 = vpop.xlane.xlu0 %56 }
  0x8d   :  { %v59_v3 = vmul.f32 0.03125, %v57_v2 }
  0x8f   :  { %v60_v4 = vsub.f32 %v51_v0, %v59_v3 }
  0x91   :  { %v61_v5 = vmul.f32 %v60_v4, %v60_v4 }
  0x93   :  { %v62_v6 = vsel %vm54_vm0, %v61_v5, 0.0 }
  0x94   :  { %63 = vadd.xlane.f32.xlu0 %v62_v6 }
 0x11d   :  { %v64_v12 = vpop.xlane.xlu0 %63 }
 0x11e   :  { %v65_v13 = vmul.f32 0.03125, %v64_v12 }
 0x120   :  { %v66_v14 = vadd.f32 1e-12, %v65_v13 }
 0x122   :  { %2694 = vrsqrt.f32 %v66_v14 }
 0x12f   :  { %v2695_v15 = vpop.eup %2694 }
 0x130   :  { %v68_v17 = vmul.f32 %v2695_v15, %v60_v4 }
 0x132   :  { %v75_v19 = vmul.f32 %v2281_v16, %v68_v17  ;;  %v847_v17 = vld [vmem:[%s3342_s5 + $0x18] sm:$0xff] }
 0x134   :  { %v2892_v20 = vadd.f32 %v2282_v18, %v75_v19  ;;  %v846_v18 = vld [vmem:[%s3342_s5 + $0x10] sm:$0xff] }
 0x136   :  { %2470 = vmatmul.mubr.msk.f32.vlgmr.msra.gmra.mxu1 %vm54_vm0, %v2892_v20 }
 0x137   :  { %2474 = vmatprep.mubr.msk.f32.mxu1 %vm2763_vm1, %v2762_v8 }
 0x1f6   :  { %v163_v22 = vpop.f32.mrf.mxu1 }
 0x1f7   :  { %v2901_v23 = vadd.f32 %v2283_v21, %v163_v22  ;;  %v845_v21 = vld [vmem:[%s3342_s5 + $0x8] sm:$0xff] }
 0x1f8   :  { %v2471_v24 = vpop.f32.mrf.mxu1 }
 0x1f9   :  { %332 = vrot.lane.b32.xlu0 %v2901_v23, %s2764_s1  ;;  %168 = vrot.lane.b32.xlu1 %v2901_v23, %s2765_s2 }
 0x1fd   :  { %334 = vrot.lane.b32.xlu1 %v2901_v23, %s2766_s18 }
 0x201   :  { %499 = vrot.lane.b32.xlu1 %v2901_v23, %s2767_s19 }
 0x205   :  { %497 = vrot.lane.b32.xlu1 %v2901_v23, %s2768_s20 }
 0x209   :  { %664 = vrot.lane.b32.xlu1 %v2901_v23, %s2769_s21 }
 0x20d   :  { %662 = vrot.lane.b32.xlu1 %v2901_v23, %s2770_s0 }
 0x26b   :  { %v169_v25 = vpop.permute.xlu1 %168  ;;  %v333_v27 = vpop.permute.xlu0 %332 }
 0x26c   :  { %2473 = vmatpush3.xpose.msk.msra.mxu1 %vm170_vm2, %v169_v25 }
 0x26d   :  { %2477 = vmatprep.subr.mxu1 %v2762_v8 }
 0x26f   :  { %2475 = vmatmul.mubr.msk.f32.vlgmr.msra.gmra.mxu1 %vm170_vm2, %v2901_v23  ;;  %v335_v26 = vpop.permute.xlu1 %334 }
 0x270   :  { %2483 = vmatpush3.xpose.msk.msra.mxu0 %vm170_vm2, %v335_v26  ;;  %2479 = vmatprep.mubr.msk.f32.mxu1 %vm2763_vm1, %v2762_v8 }
 0x271   :  { %2492 = vmatprep.subr.mxu0 %v2762_v8 }
 0x273   :  { %2485 = vmatmul.mubr.msk.f32.vlgmr.msra.gmra.mxu0 %vm170_vm2, %v333_v27  ;;  %v500_v28 = vpop.permute.xlu1 %499 }
 0x274   :  { %2493 = vmatpush3.xpose.msk.msra.mxu0 %vm170_vm2, %v500_v28  ;;  %2494 = vmatprep.mubr.msk.f32.mxu0 %vm2763_vm1, %v2762_v8 }
 0x275   :  { %2502 = vmatprep.subr.mxu0 %v2762_v8 }
 0x277   :  { %v498_v29 = vpop.permute.xlu1 %497 }
 0x278   :  { %2495 = vmatmul.mubr.msk.f32.vlgmr.msra.gmra.mxu0 %vm170_vm2, %v498_v29 }
 0x279   :  { %2504 = vmatprep.mubr.msk.f32.mxu0 %vm2763_vm1, %v2762_v8 }
 0x27b   :  { %v665_v30 = vpop.permute.xlu1 %664 }
 0x27c   :  { %2503 = vmatpush3.xpose.msk.msra.mxu0 %vm170_vm2, %v665_v30 }
 0x27d   :  { %2534 = vmatprep.subr.mxu0 %v2762_v8 }
 0x27f   :  { %v663_v31 = vpop.permute.xlu1 %662 }
 0x280   :  { %2505 = vmatmul.mubr.msk.f32.vlgmr.msra.gmra.mxu0 %vm170_vm2, %v663_v31 }
 0x281   :  { %2566 = vmatprep.mubr.msk.f32.mxu0 %vm2763_vm1, %v2762_v8 }
 0x32f   :  { %v241_v32 = vpop.f32.mrf.mxu1 }
 0x330   :  { %v245_v33 = vsel %vm170_vm2, %v241_v32, -inf }
 0x331   :  { %246 = vmax.xlane.f32.xlu1 %v245_v33  ;;  %v2476_v34 = vpop.f32.mrf.mxu1 }
 0x333   :  { %v406_v35 = vpop.f32.mrf.mxu0 }
 0x334   :  { %v410_v36 = vsel %vm170_vm2, %v406_v35, -inf }
 0x335   :  { %411 = vmax.xlane.f32.xlu0 %v410_v36  ;;  %v2486_v37 = vpop.f32.mrf.mxu0  ;;  %v2297_v36 = vld [vmem:[%s3343_s6] ss:$0 sm:$0xff] }
 0x338   :  { %v571_v38 = vpop.f32.mrf.mxu0 }
 0x339   :  { %v575_v39 = vsel %vm170_vm2, %v571_v38, -inf }
 0x33a   :  { %v2496_v40 = vpop.f32.mrf.mxu0  ;;  %576 = vmax.xlane.f32.xlu1 %v575_v39 }
 0x340   :  { %v736_v41 = vpop.f32.mrf.mxu0 }
 0x341   :  { %v740_v42 = vsel %vm170_vm2, %v736_v41, -inf }
 0x342   :  { %741 = vmax.xlane.f32.xlu0 %v740_v42  ;;  %v2506_v43 = vpop.f32.mrf.mxu0 }
 0x34b   :  { %256 = vrot.lane.b32.xlu1 %v2901_v23, %s2771_s22 }
 0x3ba   :  { %v247_v44 = vpop.xlane.xlu1 %246 }
 0x3bb   :  { %v248_v45 = vsub.f32 %v241_v32, %v247_v44 }
 0x3bd   :  { %v249_v46 = vmul.f32 1.442695, %v248_v45 }
 0x3be   :  { %v412_v47 = vpop.xlane.xlu0 %411 }
 0x3bf   :  { %2696 = vpow2.f32 %v249_v46  ;;  %v413_v48 = vsub.f32 %v406_v35, %v412_v47  ;;  %v961_v47 = vld [vmem:[%s3346_s9 + $0x18] sm:$0xff] }
 0x3c1   :  { %v414_v49 = vmul.f32 1.442695, %v413_v48  ;;  %v960_v48 = vld [vmem:[%s3346_s9 + $0x10] sm:$0xff] }
 0x3c3   :  { %2698 = vpow2.f32 %v414_v49  ;;  %v577_v50 = vpop.xlane.xlu1 %576  ;;  %v958_v49 = vld [vmem:[%s3346_s9] sm:$0xff] }
 0x3c4   :  { %v578_v51 = vsub.f32 %v571_v38, %v577_v50  ;;  %v1062_v50 = vld [vmem:[%s3348_s11 + $0x78] sm:$0xff] }
 0x3c5   :  { %2535 = vmatpush3.msra.mxu0 %v1062_v50 }
 0x3c6   :  { %v579_v52 = vmul.f32 1.442695, %v578_v51  ;;  %v1061_v51 = vld [vmem:[%s3348_s11 + $0x70] sm:$0xff]  ;;  %2536 = vmatprep.subr.mxu0 %v2762_v8 }
 0x3c7   :  { %v257_v53 = vpop.permute.xlu1 %256  ;;  %2537 = vmatpush3.msra.mxu0 %v1061_v51 }
 0x3c8   :  { %2700 = vpow2.f32 %v579_v52  ;;  %2478 = vmatpush3.msra.mxu1 %v257_v53  ;;  %v1060_v52 = vld [vmem:[%s3348_s11 + $0x68] sm:$0xff]  ;;  %2538 = vmatprep.subr.mxu0 %v2762_v8  ;;  %v1059_v53 = vld [vmem:[%s3348_s11 + $0x60] sm:$0xff] }
 0x3c9   :  { %2487 = vmatprep.subr.mxu1 %v2762_v8  ;;  %2539 = vmatpush3.msra.mxu0 %v1060_v52 }
 0x3ca   :  { %2540 = vmatprep.subr.mxu0 %v2762_v8 }
 0x3cb   :  { %v742_v54 = vpop.xlane.xlu0 %741  ;;  %2541 = vmatpush3.msra.mxu0 %v1059_v53 }
 0x3cc   :  { %v2697_v55 = vpop.eup %2696  ;;  %v743_v56 = vsub.f32 %v736_v41, %v742_v54  ;;  %2542 = vmatprep.subr.mxu0 %v2762_v8 }
 0x3cd   :  { %v251_v57 = vsel %vm170_vm2, %v2697_v55, 0.0 }
 0x3ce   :  { %v744_v58 = vmul.f32 1.442695, %v743_v56  ;;  %252 = vadd.xlane.f32.xlu1 %v251_v57 }
 0x3d0   :  { %v2699_v59 = vpop.eup %2698  ;;  %2702 = vpow2.f32 %v744_v58  ;;  %v2299_v58 = vld [vmem:[%s3344_s7] ss:$0 sm:$0xff] }
 0x3d1   :  { %v416_v60 = vsel %vm170_vm2, %v2699_v59, 0.0 }
 0x3d2   :  { %417 = vadd.xlane.f32.xlu0 %v416_v60  ;;  %v2300_v60 = vld [vmem:[%s3345_s8] ss:$0 sm:$0xff] }
 0x3d5   :  { %v2701_v61 = vpop.eup %2700 }
 0x3d6   :  { %v581_v62 = vsel %vm170_vm2, %v2701_v61, 0.0 }
 0x3d7   :  { %582 = vadd.xlane.f32.xlu1 %v581_v62 }
 0x3dd   :  { %v2703_v63 = vpop.eup %2702 }
 0x3de   :  { %v746_v0 = vsel %vm170_vm2, %v2703_v63, 0.0 }
 0x3df   :  { %747 = vadd.xlane.f32.xlu0 %v746_v0  ;;  %v1057_v0 = vld [vmem:[%s3348_s11 + $0x50] sm:$0xff] }
 0x3e8   :  { %586 = vrot.lane.b32.xlu1 %v2901_v23, %s2772_s23 }
 0x3ec   :  { %751 = vrot.lane.b32.xlu1 %v2901_v23, %s3355_s24  ;;  %s3360_s24 = smov 24  }
 0x3f5   :  { %421 = vrot.lane.b32.xlu0 %v2901_v23, %s2774_s25  ;;  %v844_v23 = vld [vmem:[%s3342_s5] sm:$0xff] }
 0x457   :  { %v253_v1 = vpop.xlane.xlu1 %252 }
 0x458   :  { %2704 = vrcp.f32 %v253_v1  ;;  %v1056_v1 = vld [vmem:[%s3348_s11 + $0x48] sm:$0xff] }
 0x45b   :  { %v418_v2 = vpop.xlane.xlu0 %417 }
 0x45c   :  { %2706 = vrcp.f32 %v418_v2  ;;  %v1055_v2 = vld [vmem:[%s3348_s11 + $0x40] sm:$0xff] }
 0x460   :  { %v583_v3 = vpop.xlane.xlu1 %582 }
 0x461   :  { %2708 = vrcp.f32 %v583_v3  ;;  %v1054_v3 = vld [vmem:[%s3348_s11 + $0x38] sm:$0xff] }
 0x464   :  { %v587_v9 = vpop.permute.xlu1 %586 }
 0x465   :  { %v2705_v4 = vpop.eup %2704 }
 0x466   :  { %v255_v5 = vmul.f32 %v2705_v4, %v2697_v55  ;;  %v1053_v4 = vld [vmem:[%s3348_s11 + $0x30] sm:$0xff] }
 0x468   :  { %v748_v6 = vpop.xlane.xlu0 %747  ;;  %2480 = vmatmul.mubr.msk.f32.vlgmr.msra.gmra.mxu1 %vm170_vm2, %v255_v5  ;;  %v752_v14 = vpop.permute.xlu1 %751  ;;  %v1052_v5 = vld [vmem:[%s3348_s11 + $0x28] sm:$0xff] }
 0x469   :  { %v2707_v7 = vpop.eup %2706  ;;  %2710 = vrcp.f32 %v748_v6  ;;  %2489 = vmatprep.mubr.msk.f32.mxu1 %vm2763_vm1, %v2762_v8  ;;  %v1051_v6 = vld [vmem:[%s3348_s11 + $0x20] sm:$0xff] }
 0x46a   :  { %v420_v11 = vmul.f32 %v2707_v7, %v2699_v59  ;;  %v1050_v7 = vld [vmem:[%s3348_s11 + $0x18] sm:$0xff] }
 0x46c   :  { %v422_v10 = vpop.permute.xlu0 %421 }
 0x46d   :  { %2488 = vmatpush3.msra.mxu1 %v422_v10  ;;  %v1048_v10 = vld [vmem:[%s3348_s11 + $0x8] sm:$0xff] }
 0x46e   :  { %v2709_v12 = vpop.eup %2708  ;;  %2490 = vmatmul.mubr.msk.f32.vlgmr.msra.gmra.mxu1 %vm170_vm2, %v420_v11  ;;  %2497 = vmatprep.subr.mxu1 %v2762_v8  ;;  %v1047_v11 = vld [vmem:[%s3348_s11] sm:$0xff] }
 0x46f   :  { %2498 = vmatpush3.msra.mxu1 %v587_v9  ;;  %2499 = vmatprep.mubr.msk.f32.mxu1 %vm2763_vm1, %v2762_v8  ;;  %v585_v13 = vmul.f32 %v2709_v12, %v2701_v61  ;;  %v1049_v9 = vld [vmem:[%s3348_s11 + $0x10] sm:$0xff]  ;;  %v2301_v12 = vld [vmem:[%s3347_s10] ss:$0 sm:$0xff] }
 0x470   :  { %2507 = vmatprep.subr.mxu1 %v2762_v8 }
 0x472   :  { %2500 = vmatmul.mubr.msk.f32.vlgmr.msra.gmra.mxu1 %vm170_vm2, %v585_v13 }
 0x473   :  { %2508 = vmatpush3.msra.mxu1 %v752_v14  ;;  %2509 = vmatprep.mubr.msk.f32.mxu1 %vm2763_vm1, %v2762_v8 }
 0x474   :  { %2512 = vmatprep.subr.mxu1 %v2762_v8 }
 0x476   :  { %v2711_v15 = vpop.eup %2710 }
 0x477   :  { %v750_v16 = vmul.f32 %v2711_v15, %v2703_v63  ;;  %v1058_v63 = vld [vmem:[%s3348_s11 + $0x58] sm:$0xff] }
 0x478   :  { %2543 = vmatpush3.msra.mxu0 %v1058_v63 }
 0x479   :  { %2510 = vmatmul.mubr.msk.f32.vlgmr.msra.gmra.mxu1 %vm170_vm2, %v750_v16  ;;  %2544 = vmatprep.subr.mxu0 %v2762_v8 }
 0x47a   :  { %2520 = vmatprep.mubr.msk.f32.mxu1 %vm2763_vm1, %v2762_v8  ;;  %2513 = vmatpush3.msra.mxu1 %v847_v17 }
 0x47b   :  { %2514 = vmatprep.subr.mxu1 %v2762_v8  ;;  %2545 = vmatpush3.msra.mxu0 %v1057_v0 }
 0x47c   :  { %2515 = vmatpush3.msra.mxu1 %v846_v18  ;;  %2546 = vmatprep.subr.mxu0 %v2762_v8 }
 0x47d   :  { %2516 = vmatprep.subr.mxu1 %v2762_v8  ;;  %2547 = vmatpush3.msra.mxu0 %v1056_v1 }
 0x47e   :  { %2517 = vmatpush3.msra.mxu1 %v845_v21  ;;  %2548 = vmatprep.subr.mxu0 %v2762_v8 }
 0x47f   :  { %2518 = vmatprep.subr.mxu1 %v2762_v8  ;;  %2549 = vmatpush3.msra.mxu0 %v1055_v2 }
 0x480   :  { %2519 = vmatpush3.msra.mxu1 %v844_v23  ;;  %2550 = vmatprep.subr.mxu0 %v2762_v8 }
 0x481   :  { %2523 = vmatprep.subr.mxu1 %v2762_v8  ;;  %2551 = vmatpush3.msra.mxu0 %v1054_v3 }
 0x482   :  { %2552 = vmatprep.subr.mxu0 %v2762_v8 }
 0x483   :  { %2553 = vmatpush3.msra.mxu0 %v1053_v4 }
 0x484   :  { %2554 = vmatprep.subr.mxu0 %v2762_v8 }
 0x485   :  { %2555 = vmatpush3.msra.mxu0 %v1052_v5 }
 0x486   :  { %2556 = vmatprep.subr.mxu0 %v2762_v8 }
 0x487   :  { %2557 = vmatpush3.msra.mxu0 %v1051_v6 }
 0x488   :  { %2558 = vmatprep.subr.mxu0 %v2762_v8 }
 0x489   :  { %2559 = vmatpush3.msra.mxu0 %v1050_v7 }
 0x48a   :  { %2560 = vmatprep.subr.mxu0 %v2762_v8 }
 0x48b   :  { %2561 = vmatpush3.msra.mxu0 %v1049_v9 }
 0x48c   :  { %2562 = vmatprep.subr.mxu0 %v2762_v8 }
 0x48d   :  { %2563 = vmatpush3.msra.mxu0 %v1048_v10 }
 0x48e   :  { %2564 = vmatprep.subr.mxu0 %v2762_v8 }
 0x48f   :  { %2565 = vmatpush3.msra.mxu0 %v1047_v11 }
 0x490   :  { %2610 = vmatprep.subr.mxu0 %v2762_v8 }
 0x528   :  { %v328_v19 = vpop.f32.mrf.mxu1 }
 0x52a   :  { %v2481_v22 = vpop.f32.mrf.mxu1 }
 0x52b   :  { %v2303_v22 = vld [vmem:[%s3349_s12] ss:$0 sm:$0xff] }
 0x52e   :  { %v493_v24 = vpop.f32.mrf.mxu1 }
 0x52f   :  { %828 = vrot.lane.b32.xlu0 %v493_v24, %s3356_s27 }
 0x530   :  { %v2491_v25 = vpop.f32.mrf.mxu1 }
 0x532   :  { %v658_v26 = vpop.f32.mrf.mxu1 }
 0x533   :  { %832 = vrot.lane.b32.xlu1 %v658_v26, %s3354_s28 }
 0x534   :  { %v2501_v27 = vpop.f32.mrf.mxu1 }
 0x539   :  { %v823_v28 = vpop.f32.mrf.mxu1 }
 0x53a   :  { %836 = vrot.lane.b32.xlu0 %v823_v28, %s3353_s29 }
 0x53b   :  { %v2511_v29 = vpop.f32.mrf.mxu1 }
 0x5a1   :  { %v829_v30 = vpop.permute.xlu0 %828 }
 0x5a2   :  { %v839_v32 = vsel %vm170_vm2, %v328_v19, %v829_v30 }
 0x5a5   :  { %v833_v31 = vpop.permute.xlu1 %832 }
 0x5a6   :  { %v841_v33 = vsel %vm840_vm3, %v839_v32, %v833_v31 }
 0x5ac   :  { %v837_v34 = vpop.permute.xlu0 %836 }
 0x5ad   :  { %v843_v35 = vsel %vm842_vm4, %v841_v33, %v837_v34  ;;  %v2309_v33 = vld [vmem:[%s3340_s3 + $0x38] sm:$0xff]  ;;  %v2308_v34 = vld [vmem:[%s3340_s3 + $0x30] sm:$0xff] }
 0x5ae   :  { %2521 = vmatmul.mubr.msk.f32.vlgmr.msra.gmra.mxu1 %vm54_vm0, %v843_v35  ;;  %v2307_v35 = vld [vmem:[%s3340_s3 + $0x28] sm:$0xff] }
 0x5af   :  { %2531 = vmatprep.mubr.msk.f32.mxu1 %vm2763_vm1, %v2762_v8  ;;  %2524 = vmatpush3.msra.mxu1 %v961_v47 }
 0x5b0   :  { %2525 = vmatprep.subr.mxu1 %v2762_v8 }
 0x5b1   :  { %2526 = vmatpush3.msra.mxu1 %v960_v48 }
 0x5b2   :  { %2527 = vmatprep.subr.mxu1 %v2762_v8 }
 0x66e   :  { %v924_v37 = vpop.f32.mrf.mxu1 }
 0x66f   :  { %v925_v38 = vadd.f32 %v2297_v36, %v924_v37  ;;  %v2306_v36 = vld [vmem:[%s3340_s3 + $0x20] sm:$0xff] }
 0x670   :  { %v2522_v39 = vpop.f32.mrf.mxu1 }
 0x671   :  { %v928_v40 = vadd.f32 %v925_v38, %v2892_v20  ;;  %v959_v20 = vld [vmem:[%s3346_s9 + $0x8] sm:$0xff] }
 0x672   :  { %2528 = vmatpush3.msra.mxu1 %v959_v20 }
 0x673   :  { %v931_v41 = vsel %vm54_vm0, %v928_v40, 0.0  ;;  %2529 = vmatprep.subr.mxu1 %v2762_v8 }
 0x674   :  { %932 = vadd.xlane.f32.xlu1 %v931_v41  ;;  %2530 = vmatpush3.msra.mxu1 %v958_v49  ;;  %v2304_v41 = vld [vmem:[%s3350_s13] ss:$0 sm:$0xff] }
 0x675   :  { %2569 = vmatprep.subr.mxu1 %v2762_v8 }
 0x6fd   :  { %v933_v42 = vpop.xlane.xlu1 %932 }
 0x6fe   :  { %v934_v43 = vmul.f32 0.03125, %v933_v42 }
 0x700   :  { %v935_v44 = vsub.f32 %v928_v40, %v934_v43  ;;  %v2305_v43 = vld [vmem:[%s3351_s14] ss:$0 sm:$0xff] }
 0x702   :  { %v936_v45 = vmul.f32 %v935_v44, %v935_v44 }
 0x704   :  { %v937_v46 = vsel %vm54_vm0, %v936_v45, 0.0 }
 0x705   :  { %938 = vadd.xlane.f32.xlu0 %v937_v46  ;;  %v2311_v46 = vld [vmem:[%s3341_s4 + $0x1] ss:$0 sm:$0xff]  ;;  %s3357_s4 = smov 8  }
 0x78e   :  { %v939_v54 = vpop.xlane.xlu0 %938 }
 0x78f   :  { %v940_v55 = vmul.f32 0.03125, %v939_v54 }
 0x791   :  { %v941_v56 = vadd.f32 1e-12, %v940_v55 }
 0x793   :  { %2712 = vrsqrt.f32 %v941_v56 }
 0x7a0   :  { %v2713_v57 = vpop.eup %2712 }
 0x7a1   :  { %v943_v59 = vmul.f32 %v2713_v57, %v935_v44 }
 0x7a3   :  { %v950_v61 = vmul.f32 %v2299_v58, %v943_v59 }
 0x7a5   :  { %v957_v62 = vadd.f32 %v2300_v60, %v950_v61 }
 0x7a7   :  { %2532 = vmatmul.mubr.msk.f32.vlgmr.msra.gmra.mxu1 %vm54_vm0, %v957_v62 }
 0x7a8   :  { %2577 = vmatprep.mubr.msk.f32.mxu1 %vm2763_vm1, %v2762_v8  ;;  %2570 = vmatpush3.msra.mxu1 %v2309_v33 }
 0x7a9   :  { %2571 = vmatprep.subr.mxu1 %v2762_v8 }
 0x7aa   :  { %2572 = vmatpush3.msra.mxu1 %v2308_v34 }
 0x7ab   :  { %2573 = vmatprep.subr.mxu1 %v2762_v8 }
 0x7ac   :  { %2574 = vmatpush3.msra.mxu1 %v2307_v35 }
 0x7ad   :  { %2575 = vmatprep.subr.mxu1 %v2762_v8 }
 0x7ae   :  { %2576 = vmatpush3.msra.mxu1 %v2306_v36 }
 0x7af   :  { %2580 = vmatprep.subr.mxu1 %v2762_v8 }
 0x867   :  { %v1038_v13 = vpop.f32.mrf.mxu1 }
 0x868   :  { %v1039_v14 = vadd.f32 %v2301_v12, %v1038_v13 }
 0x869   :  { %v2533_v15 = vpop.f32.mrf.mxu1 }
 0x86a   :  { %v1043_v16 = vmul.f32 0.70710677, %v1039_v14  ;;  %v1042_v18 = vmul.f32 0.5, %v1039_v14 }
 0x86c   :  { %2714 = verf.f32 %v1043_v16 }
 0x879   :  { %v2715_v17 = vpop.eup %2714 }
 0x87a   :  { %v1045_v19 = vadd.f32 1.0, %v2715_v17 }
 0x87c   :  { %v1046_v21 = vmul.f32 %v1045_v19, %v1042_v18 }
 0x87e   :  { %2567 = vmatmul.mubr.f32.vlgmr.msra.gmra.mxu0 %v1046_v21 }
 0x87f   :  { %2612 = vmatprep.mubr.msk.f32.mxu0 %vm2763_vm1, %v2762_v8 }
 0x93e   :  { %v1136_v23 = vpop.f32.mrf.mxu0 }
 0x93f   :  { %v1137_v24 = vadd.f32 %v2303_v22, %v1136_v23 }
 0x940   :  { %v2568_v25 = vpop.f32.mrf.mxu0 }
 0x941   :  { %v1140_v26 = vadd.f32 %v1137_v24, %v957_v62 }
 0x943   :  { %v1143_v27 = vsel %vm54_vm0, %v1140_v26, 0.0 }
 0x944   :  { %1144 = vadd.xlane.f32.xlu0 %v1143_v27 }
 0x9cd   :  { %v1145_v28 = vpop.xlane.xlu0 %1144 }
 0x9ce   :  { %v1146_v29 = vmul.f32 0.03125, %v1145_v28 }
 0x9d0   :  { %v1147_v30 = vsub.f32 %v1140_v26, %v1146_v29 }
 0x9d2   :  { %v1148_v31 = vmul.f32 %v1147_v30, %v1147_v30 }
 0x9d4   :  { %v1149_v32 = vsel %vm54_vm0, %v1148_v31, 0.0 }
 0x9d5   :  { %1150 = vadd.xlane.f32.xlu1 %v1149_v32 }
 0xa5e   :  { %v1151_v37 = vpop.xlane.xlu1 %1150 }
 0xa5f   :  { %v1152_v38 = vmul.f32 0.03125, %v1151_v37 }
 0xa61   :  { %v1153_v39 = vadd.f32 1e-12, %v1152_v38 }
 0xa63   :  { %2716 = vrsqrt.f32 %v1153_v39 }
 0xa70   :  { %v2717_v40 = vpop.eup %2716 }
 0xa71   :  { %v1155_v42 = vmul.f32 %v2717_v40, %v1147_v30 }
 0xa73   :  { %v1162_v44 = vmul.f32 %v2304_v41, %v1155_v42 }
 0xa75   :  { %v3122_v45 = vadd.f32 %v2305_v43, %v1162_v44 }
 0xa77   :  { %2578 = vmatmul.mubr.msk.f32.vlgmr.msra.gmra.mxu1 %vm54_vm0, %v3122_v45 }
 0xa78   :  { %2582 = vmatprep.mubr.msk.f32.mxu1 %vm2763_vm1, %v2762_v8 }
 0xb37   :  { %v1252_v47 = vpop.f32.mrf.mxu1 }
 0xb38   :  { %v3131_v48 = vadd.f32 %v2311_v46, %v1252_v47  ;;  %v2328_v47 = vld [vmem:[%s3342_s5 + $0x38] sm:$0xff] }
 0xb39   :  { %v2579_v20 = vpop.f32.mrf.mxu1 }
 0xb3a   :  { %1257 = vrot.lane.b32.xlu0 %v3131_v48, %s2765_s2  ;;  %v2326_v20 = vld [vmem:[%s3342_s5 + $0x28] sm:$0xff] }
 0xb3e   :  { %1422 = vrot.lane.b32.xlu0 %v3131_v48, %s2766_s18 }
 0xb42   :  { %1420 = vrot.lane.b32.xlu0 %v3131_v48, %s2764_s1  ;;  %s3358_s1 = smov 40  }
 0xbac   :  { %v1258_v49 = vpop.permute.xlu0 %1257 }
 0xbad   :  { %2581 = vmatpush3.xpose.msk.msra.mxu1 %vm170_vm2, %v1258_v49  ;;  %v2325_v49 = vld [vmem:[%s3342_s5 + $0x20] sm:$0xff] }
 0xbae   :  { %2585 = vmatprep.subr.mxu1 %v2762_v8 }
 0xbb0   :  { %2583 = vmatmul.mubr.msk.f32.vlgmr.msra.gmra.mxu1 %vm170_vm2, %v3131_v48  ;;  %v1423_v61 = vpop.permute.xlu0 %1422 }
 0xbb1   :  { %2587 = vmatprep.mubr.msk.f32.mxu1 %vm2763_vm1, %v2762_v8 }
 0xbb4   :  { %v1421_v63 = vpop.permute.xlu0 %1420 }
 0xc70   :  { %v1329_v50 = vpop.f32.mrf.mxu1 }
 0xc71   :  { %v1333_v51 = vsel %vm170_vm2, %v1329_v50, -inf }
 0xc72   :  { %1334 = vmax.xlane.f32.xlu1 %v1333_v51  ;;  %v2584_v52 = vpop.f32.mrf.mxu1 }
 0xcfb   :  { %v1335_v53 = vpop.xlane.xlu1 %1334 }
 0xcfc   :  { %v1336_v54 = vsub.f32 %v1329_v50, %v1335_v53 }
 0xcfe   :  { %v1337_v55 = vmul.f32 1.442695, %v1336_v54 }
 0xd00   :  { %2718 = vpow2.f32 %v1337_v55 }
 0xd0d   :  { %v2719_v56 = vpop.eup %2718 }
 0xd0e   :  { %v1339_v57 = vsel %vm170_vm2, %v2719_v56, 0.0 }
 0xd0f   :  { %1340 = vadd.xlane.f32.xlu1 %v1339_v57 }
 0xd20   :  { %1344 = vrot.lane.b32.xlu1 %v3131_v48, %s2771_s22 }
 0xd98   :  { %v1341_v58 = vpop.xlane.xlu1 %1340 }
 0xd99   :  { %2720 = vrcp.f32 %v1341_v58 }
 0xd9c   :  { %v1345_v59 = vpop.permute.xlu1 %1344 }
 0xd9d   :  { %2586 = vmatpush3.msra.mxu1 %v1345_v59 }
 0xd9e   :  { %2590 = vmatprep.subr.mxu1 %v2762_v8 }
 0xda6   :  { %v2721_v60 = vpop.eup %2720 }
 0xda7   :  { %v1343_v62 = vmul.f32 %v2721_v60, %v2719_v56  ;;  %v2330_v60 = vld [vmem:[%s3343_s6 + $0x1] ss:$0 sm:$0xff] }
 0xda9   :  { %2588 = vmatmul.mubr.msk.f32.vlgmr.msra.gmra.mxu1 %vm170_vm2, %v1343_v62 }
 0xdaa   :  { %2591 = vmatpush3.xpose.msk.msra.mxu1 %vm170_vm2, %v1423_v61  ;;  %2592 = vmatprep.mubr.msk.f32.mxu1 %vm2763_vm1, %v2762_v8 }
 0xdab   :  { %2595 = vmatprep.subr.mxu1 %v2762_v8 }
 0xdad   :  { %2593 = vmatmul.mubr.msk.f32.vlgmr.msra.gmra.mxu1 %vm170_vm2, %v1421_v63 }
 0xdae   :  { %2597 = vmatprep.mubr.msk.f32.mxu1 %vm2763_vm1, %v2762_v8 }
 0xe69   :  { %v3158_v0 = vpop.f32.mrf.mxu1 }
 0xe6b   :  { %v2589_v1 = vpop.f32.mrf.mxu1 }
 0xe6d   :  { %v1494_v2 = vpop.f32.mrf.mxu1 }
 0xe6e   :  { %v1498_v3 = vsel %vm170_vm2, %v1494_v2, -inf }
 0xe6f   :  { %1499 = vmax.xlane.f32.xlu1 %v1498_v3  ;;  %v2594_v4 = vpop.f32.mrf.mxu1 }
 0xe80   :  { %1587 = vrot.lane.b32.xlu1 %v3131_v48, %s2767_s19 }
 0xe84   :  { %1585 = vrot.lane.b32.xlu1 %v3131_v48, %s2768_s20 }
 0xe88   :  { %1750 = vrot.lane.b32.xlu1 %v3131_v48, %s2770_s0 }
 0xef8   :  { %v1500_v5 = vpop.xlane.xlu1 %1499 }
 0xef9   :  { %v1501_v6 = vsub.f32 %v1494_v2, %v1500_v5 }
 0xefb   :  { %v1502_v7 = vmul.f32 1.442695, %v1501_v6 }
 0xefc   :  { %v1588_v11 = vpop.permute.xlu1 %1587 }
 0xefd   :  { %2722 = vpow2.f32 %v1502_v7  ;;  %v2339_v7 = vld [vmem:[%s3346_s9 + $0x38] sm:$0xff] }
 0xf00   :  { %v1586_v14 = vpop.permute.xlu1 %1585 }
 0xf04   :  { %v1751_v16 = vpop.permute.xlu1 %1750 }
 0xf0a   :  { %v2723_v9 = vpop.eup %2722 }
 0xf0b   :  { %v1504_v10 = vsel %vm170_vm2, %v2723_v9, 0.0 }
 0xf0c   :  { %1505 = vadd.xlane.f32.xlu0 %v1504_v10  ;;  %v2336_v10 = vld [vmem:[%s3346_s9 + $0x20] sm:$0xff] }
 0xf22   :  { %1509 = vrot.lane.b32.xlu0 %v3131_v48, %s2774_s25  ;;  %s3359_s25 = smov 16  }
 0xf26   :  { %1752 = vrot.lane.b32.xlu0 %v3131_v48, %s2769_s21 }
 0xf95   :  { %v1506_v12 = vpop.xlane.xlu0 %1505 }
 0xf96   :  { %2724 = vrcp.f32 %v1506_v12  ;;  %v2357_v12 = vld [vmem:[%s3348_s11 + $0xf0] sm:$0xff] }
 0xf99   :  { %v1510_v13 = vpop.permute.xlu0 %1509 }
 0xf9a   :  { %2596 = vmatpush3.msra.mxu1 %v1510_v13  ;;  %v2356_v13 = vld [vmem:[%s3348_s11 + $0xe8] sm:$0xff] }
 0xf9b   :  { %2600 = vmatprep.subr.mxu1 %v2762_v8 }
 0xf9d   :  { %v1753_v15 = vpop.permute.xlu0 %1752 }
 0xf9e   :  { %2611 = vmatpush3.xpose.msk.msra.mxu0 %vm170_vm2, %v1753_v15 }
 0xf9f   :  { %2620 = vmatprep.subr.mxu0 %v2762_v8 }
 0xfa1   :  { %2613 = vmatmul.mubr.msk.f32.vlgmr.msra.gmra.mxu0 %vm170_vm2, %v1751_v16 }
 0xfa2   :  { %2628 = vmatprep.mubr.msk.f32.mxu0 %vm2763_vm1, %v2762_v8  ;;  %2621 = vmatpush3.msra.mxu0 %v2328_v47  ;;  %v2360_v47 = vld [vmem:[%s3349_s12 + $0x1] ss:$0 sm:$0xff] }
 0xfa3   :  { %v2725_v17 = vpop.eup %2724  ;;  %2622 = vmatprep.subr.mxu0 %v2762_v8 }
 0xfa4   :  { %v1508_v18 = vmul.f32 %v2725_v17, %v2723_v9  ;;  %v2338_v9 = vld [vmem:[%s3346_s9 + $0x30] sm:$0xff] }
 0xfa6   :  { %2598 = vmatmul.mubr.msk.f32.vlgmr.msra.gmra.mxu1 %vm170_vm2, %v1508_v18 }
 0xfa7   :  { %2601 = vmatpush3.xpose.msk.msra.mxu1 %vm170_vm2, %v1588_v11  ;;  %2602 = vmatprep.mubr.msk.f32.mxu1 %vm2763_vm1, %v2762_v8  ;;  %v2358_v11 = vld [vmem:[%s3348_s11 + $0xf8] sm:$0xff] }
 0xfa8   :  { %2605 = vmatprep.subr.mxu1 %v2762_v8 }
 0xfaa   :  { %2603 = vmatmul.mubr.msk.f32.vlgmr.msra.gmra.mxu1 %vm170_vm2, %v1586_v14  ;;  %v2355_v14 = vld [vmem:[%s3348_s11 + $0xe0] sm:$0xff] }
 0xfab   :  { %2607 = vmatprep.mubr.msk.f32.mxu1 %vm2763_vm1, %v2762_v8 }
0x1061   :  { %v1824_v19 = vpop.f32.mrf.mxu0 }
0x1062   :  { %v1828_v21 = vsel %vm170_vm2, %v1824_v19, -inf }
0x1063   :  { %1829 = vmax.xlane.f32.xlu1 %v1828_v21  ;;  %v2614_v22 = vpop.f32.mrf.mxu0 }
0x1064   :  { %v2335_v22 = vld [vmem:[%s3345_s8 + $0x1] ss:$0 sm:$0xff] }
0x1066   :  { %v1581_v23 = vpop.f32.mrf.mxu1 }
0x1068   :  { %v2599_v24 = vpop.f32.mrf.mxu1 }
0x106a   :  { %v1659_v25 = vpop.f32.mrf.mxu1 }
0x106b   :  { %v1663_v26 = vsel %vm170_vm2, %v1659_v25, -inf }
0x106c   :  { %1664 = vmax.xlane.f32.xlu0 %v1663_v26  ;;  %v2604_v27 = vpop.f32.mrf.mxu1  ;;  %v2353_v26 = vld [vmem:[%s3348_s11 + $0xd0] sm:$0xff] }
0x106d   :  { %v2352_v27 = vld [vmem:[%s3348_s11 + $0xc8] sm:$0xff] }
0x1074   :  { %1674 = vrot.lane.b32.xlu1 %v3131_v48, %s2772_s23 }
0x1078   :  { %1916 = vrot.lane.b32.xlu1 %v1581_v23, %s3357_s4 }
0x10ec   :  { %v1830_v28 = vpop.xlane.xlu1 %1829 }
0x10ed   :  { %v1831_v29 = vsub.f32 %v1824_v19, %v1830_v28  ;;  %v2334_v19 = vld [vmem:[%s3344_s7 + $0x1] ss:$0 sm:$0xff]  ;;  %s2778_s7 = smov [#allocation2]  }
0x10ee   :  { %v2351_v28 = vld [vmem:[%s3348_s11 + $0xc0] sm:$0xff]  ;;  %s2273_s8 = sshll.u32 %s2778_s7, 4  ;;  %s2274_s8 = int_to_ptr.vmem [resolvable:$true] %s2273_s8 }
0x10ef   :  { %v1832_v30 = vmul.f32 1.442695, %v1831_v29  ;;  %v2350_v29 = vld [vmem:[%s3348_s11 + $0xb8] sm:$0xff]  ;;  %s2740_s17 = scalar_lea.vmem %s2274_s8, 128  ;;  %p2745_p1 = scmp.lt.s32.totalorder %s2274_s8, %s2274_s8 }
0x10f0   :  { %v1675_v31 = vpop.permute.xlu1 %1674  ;;  %p2741_p0 = scmp.ne.s32.totalorder %s2274_s8, %s2740_s17  ;;  %p2746_p2 = scmp.lt.s32.totalorder %s2740_s17, %s2740_s17 }
0x10f1   :  { %2726 = vpow2.f32 %v1832_v30  ;;  %2606 = vmatpush3.msra.mxu1 %v1675_v31  ;;  %v2349_v30 = vld [vmem:[%s3348_s11 + $0xb0] sm:$0xff]  ;;  %v2348_v31 = vld [vmem:[%s3348_s11 + $0xa8] sm:$0xff] }
0x10f2   :  { %2615 = vmatprep.subr.mxu1 %v2762_v8  ;;  %p2747_p3 = por %p2746_p2, %p2745_p1 }
0x10f4   :  { %v1917_v54 = vpop.permute.xlu1 %1916  ;;  %p2748_p4 = pnand %p2747_p3, %p2741_p0 }
0x10f5   :  { %v1665_v32 = vpop.xlane.xlu0 %1664  ;;  %v1927_v56 = vsel %vm170_vm2, %v3158_v0, %v1917_v54 }
0x10f6   :  { %v1666_v33 = vsub.f32 %v1659_v25, %v1665_v32  ;;  %v2354_v25 = vld [vmem:[%s3348_s11 + $0xd8] sm:$0xff]  ;;  %v2347_v32 = vld [vmem:[%s3348_s11 + $0xa0] sm:$0xff] }
0x10f8   :  { %v1667_v34 = vmul.f32 1.442695, %v1666_v33  ;;  %v2346_v33 = vld [vmem:[%s3348_s11 + $0x98] sm:$0xff] }
0x10fa   :  { %2728 = vpow2.f32 %v1667_v34  ;;  %v2345_v34 = vld [vmem:[%s3348_s11 + $0x90] sm:$0xff] }
0x10fe   :  { %v2727_v35 = vpop.eup %2726 }
0x10ff   :  { %v1834_v36 = vsel %vm170_vm2, %v2727_v35, 0.0 }
0x1100   :  { %1835 = vadd.xlane.f32.xlu0 %v1834_v36  ;;  %v2343_v36 = vld [vmem:[%s3348_s11 + $0x80] sm:$0xff] }
0x1107   :  { %v2729_v37 = vpop.eup %2728 }
0x1108   :  { %v1669_v38 = vsel %vm170_vm2, %v2729_v37, 0.0 }
0x1109   :  { %1670 = vadd.xlane.f32.xlu0 %v1669_v38 }
0x111f   :  { %1839 = vrot.lane.b32.xlu0 %v3131_v48, %s3358_s1  ;;  %v2327_v48 = vld [vmem:[%s3342_s5 + $0x30] sm:$0xff] }
0x1120   :  { %2623 = vmatpush3.msra.mxu0 %v2327_v48 }
0x1121   :  { %2624 = vmatprep.subr.mxu0 %v2762_v8 }
0x1122   :  { %2625 = vmatpush3.msra.mxu0 %v2326_v20 }
0x1123   :  { %2626 = vmatprep.subr.mxu0 %v2762_v8 }
0x1124   :  { %2627 = vmatpush3.msra.mxu0 %v2325_v49 }
0x1125   :  { %2642 = vmatprep.subr.mxu0 %v2762_v8 }
0x1189   :  { %v1836_v39 = vpop.xlane.xlu0 %1835 }
0x1192   :  { %v1671_v40 = vpop.xlane.xlu0 %1670 }
0x1193   :  { %2730 = vrcp.f32 %v1671_v40 }
0x1194   :  { %2732 = vrcp.f32 %v1836_v39 }
0x1196   :  { %v1840_v44 = vpop.permute.xlu0 %1839 }
0x11a0   :  { %v2731_v41 = vpop.eup %2730 }
0x11a1   :  { %v1673_v42 = vmul.f32 %v2731_v41, %v2729_v37  ;;  %v2733_v43 = vpop.eup %2732  ;;  %v2341_v37 = vld [vmem:[%s3347_s10 + $0x1] ss:$0 sm:$0xff] }
0x11a2   :  { %v1838_v46 = vmul.f32 %v2733_v43, %v2727_v35  ;;  %v2344_v35 = vld [vmem:[%s3348_s11 + $0x88] sm:$0xff] }
0x11a3   :  { %2608 = vmatmul.mubr.msk.f32.vlgmr.msra.gmra.mxu1 %vm170_vm2, %v1673_v42 }
0x11a4   :  { %2616 = vmatpush3.msra.mxu1 %v1840_v44  ;;  %2617 = vmatprep.mubr.msk.f32.mxu1 %vm2763_vm1, %v2762_v8 }
0x11a5   :  { %2631 = vmatprep.subr.mxu1 %v2762_v8 }
0x11a7   :  { %2618 = vmatmul.mubr.msk.f32.vlgmr.msra.gmra.mxu1 %vm170_vm2, %v1838_v46 }
0x11a8   :  { %2639 = vmatprep.mubr.msk.f32.mxu1 %vm2763_vm1, %v2762_v8  ;;  %2632 = vmatpush3.msra.mxu1 %v2339_v7 }
0x11a9   :  { %2633 = vmatprep.subr.mxu1 %v2762_v8 }
0x11aa   :  { %2634 = vmatpush3.msra.mxu1 %v2338_v9 }
0x11ab   :  { %2635 = vmatprep.subr.mxu1 %v2762_v8 }
0x1263   :  { %v1746_v50 = vpop.f32.mrf.mxu1 }
0x1264   :  { %1920 = vrot.lane.b32.xlu1 %v1746_v50, %s3359_s25 }
0x1265   :  { %v2609_v51 = vpop.f32.mrf.mxu1 }
0x1267   :  { %v1911_v52 = vpop.f32.mrf.mxu1 }
0x1268   :  { %1924 = vrot.lane.b32.xlu0 %v1911_v52, %s3360_s24 }
0x1269   :  { %v2619_v53 = vpop.f32.mrf.mxu1 }
0x12d6   :  { %v1921_v55 = vpop.permute.xlu1 %1920 }
0x12d7   :  { %v1928_v57 = vsel %vm840_vm3, %v1927_v56, %v1921_v55 }
0x12da   :  { %v1925_v58 = vpop.permute.xlu0 %1924 }
0x12db   :  { %v1929_v59 = vsel %vm842_vm4, %v1928_v57, %v1925_v58 }
0x12dc   :  { %2629 = vmatmul.mubr.msk.f32.vlgmr.msra.gmra.mxu0 %vm54_vm0, %v1929_v59 }
0x12dd   :  { %2674 = vmatprep.mubr.msk.f32.mxu0 %vm2763_vm1, %v2762_v8  ;;  %2643 = vmatpush3.msra.mxu0 %v2358_v11 }
0x12de   :  { %2644 = vmatprep.subr.mxu0 %v2762_v8 }
0x12df   :  { %2645 = vmatpush3.msra.mxu0 %v2357_v12 }
0x12e0   :  { %2646 = vmatprep.subr.mxu0 %v2762_v8 }
0x12e1   :  { %2647 = vmatpush3.msra.mxu0 %v2356_v13 }
0x12e2   :  { %2648 = vmatprep.subr.mxu0 %v2762_v8 }
0x12e3   :  { %2649 = vmatpush3.msra.mxu0 %v2355_v14 }
0x12e4   :  { %2650 = vmatprep.subr.mxu0 %v2762_v8 }
0x12e5   :  { %2651 = vmatpush3.msra.mxu0 %v2354_v25 }
0x12e6   :  { %2652 = vmatprep.subr.mxu0 %v2762_v8 }
0x12e7   :  { %2653 = vmatpush3.msra.mxu0 %v2353_v26 }
0x12e8   :  { %2654 = vmatprep.subr.mxu0 %v2762_v8 }
0x12e9   :  { %2655 = vmatpush3.msra.mxu0 %v2352_v27 }
0x12ea   :  { %2656 = vmatprep.subr.mxu0 %v2762_v8 }
0x12eb   :  { %2657 = vmatpush3.msra.mxu0 %v2351_v28 }
0x12ec   :  { %2658 = vmatprep.subr.mxu0 %v2762_v8 }
0x12ed   :  { %2659 = vmatpush3.msra.mxu0 %v2350_v29 }
0x12ee   :  { %2660 = vmatprep.subr.mxu0 %v2762_v8 }
0x12ef   :  { %2661 = vmatpush3.msra.mxu0 %v2349_v30 }
0x12f0   :  { %2662 = vmatprep.subr.mxu0 %v2762_v8 }
0x12f1   :  { %2663 = vmatpush3.msra.mxu0 %v2348_v31 }
0x12f2   :  { %2664 = vmatprep.subr.mxu0 %v2762_v8 }
0x12f3   :  { %2665 = vmatpush3.msra.mxu0 %v2347_v32 }
0x12f4   :  { %2666 = vmatprep.subr.mxu0 %v2762_v8 }
0x12f5   :  { %2667 = vmatpush3.msra.mxu0 %v2346_v33 }
0x12f6   :  { %2668 = vmatprep.subr.mxu0 %v2762_v8 }
0x12f7   :  { %2669 = vmatpush3.msra.mxu0 %v2345_v34 }
0x12f8   :  { %2670 = vmatprep.subr.mxu0 %v2762_v8 }
0x12f9   :  { %2671 = vmatpush3.msra.mxu0 %v2344_v35 }
0x12fa   :  { %2672 = vmatprep.subr.mxu0 %v2762_v8 }
0x12fb   :  { %2673 = vmatpush3.msra.mxu0 %v2343_v36 }
0x139c   :  { %v2012_v61 = vpop.f32.mrf.mxu0 }
0x139d   :  { %v2013_v62 = vadd.f32 %v2330_v60, %v2012_v61  ;;  %v2363_v60 = vld [vmem:[%s3350_s13 + $0x1] ss:$0 sm:$0xff] }
0x139e   :  { %v2630_v63 = vpop.f32.mrf.mxu0 }
0x139f   :  { %v2016_v1 = vadd.f32 %v2013_v62, %v3122_v45  ;;  %v2337_v45 = vld [vmem:[%s3346_s9 + $0x28] sm:$0xff]  ;;  %v2364_v62 = vld [vmem:[%s3351_s14 + $0x1] ss:$0 sm:$0xff] }
0x13a0   :  { %2636 = vmatpush3.msra.mxu1 %v2337_v45 }
0x13a1   :  { %v2021_v0 = vsel %vm54_vm0, %v2016_v1, 0.0  ;;  %2637 = vmatprep.subr.mxu1 %v2762_v8 }
0x13a2   :  { %2022 = vadd.xlane.f32.xlu1 %v2021_v0  ;;  %2638 = vmatpush3.msra.mxu1 %v2336_v10 }
0x142b   :  { %v2023_v2 = vpop.xlane.xlu1 %2022 }
0x142c   :  { %v2024_v3 = vmul.f32 0.03125, %v2023_v2 }
0x142e   :  { %v2025_v4 = vsub.f32 %v2016_v1, %v2024_v3 }
0x1430   :  { %v2026_v5 = vmul.f32 %v2025_v4, %v2025_v4 }
0x1432   :  { %v2027_v6 = vsel %vm54_vm0, %v2026_v5, 0.0 }
0x1433   :  { %2028 = vadd.xlane.f32.xlu0 %v2027_v6 }
0x14bc   :  { %v2029_v15 = vpop.xlane.xlu0 %2028 }
0x14bd   :  { %v2030_v16 = vmul.f32 0.03125, %v2029_v15 }
0x14bf   :  { %v2031_v17 = vadd.f32 1e-12, %v2030_v16 }
0x14c1   :  { %2734 = vrsqrt.f32 %v2031_v17 }
0x14ce   :  { %v2735_v18 = vpop.eup %2734 }
0x14cf   :  { %v2033_v21 = vmul.f32 %v2735_v18, %v2025_v4 }
0x14d1   :  { %v2040_v23 = vmul.f32 %v2334_v19, %v2033_v21 }
0x14d3   :  { %v2047_v24 = vadd.f32 %v2335_v22, %v2040_v23 }
0x14d5   :  { %2640 = vmatmul.mubr.msk.f32.vlgmr.msra.gmra.mxu1 %vm54_vm0, %v2047_v24 }
0x1595   :  { %v2130_v38 = vpop.f32.mrf.mxu1 }
0x1596   :  { %v2131_v39 = vadd.f32 %v2341_v37, %v2130_v38 }
0x1597   :  { %v2641_v40 = vpop.f32.mrf.mxu1 }
0x1598   :  { %v2135_v41 = vmul.f32 0.70710677, %v2131_v39  ;;  %v2134_v43 = vmul.f32 0.5, %v2131_v39 }
0x159a   :  { %2736 = verf.f32 %v2135_v41 }
0x15a7   :  { %v2737_v42 = vpop.eup %2736 }
0x15a8   :  { %v2137_v44 = vadd.f32 1.0, %v2737_v42 }
0x15aa   :  { %v2138_v46 = vmul.f32 %v2137_v44, %v2134_v43 }
0x15ac   :  { %2675 = vmatmul.mubr.f32.vlgmr.msra.gmra.mxu0 %v2138_v46 }
0x166c   :  { %v2230_v8 = vpop.f32.mrf.mxu0 }
0x166d   :  { %v2231_v48 = vadd.f32 %v2360_v47, %v2230_v8 }
0x166e   :  { %v2676_v20 = vpop.f32.mrf.mxu0 }
0x166f   :  { %v2234_v49 = vadd.f32 %v2231_v48, %v2047_v24 }
0x1671   :  { %v2239_v50 = vsel %vm54_vm0, %v2234_v49, 0.0 }
0x1672   :  { %2240 = vadd.xlane.f32.xlu0 %v2239_v50 }
0x16fb   :  { %v2241_v51 = vpop.xlane.xlu0 %2240 }
0x16fc   :  { %v2242_v52 = vmul.f32 0.03125, %v2241_v51 }
0x16fe   :  { %v2243_v53 = vsub.f32 %v2234_v49, %v2242_v52 }
0x1700   :  { %v2244_v54 = vmul.f32 %v2243_v53, %v2243_v53 }
0x1702   :  { %v2245_v55 = vsel %vm54_vm0, %v2244_v54, 0.0 }
0x1703   :  { %2246 = vadd.xlane.f32.xlu1 %v2245_v55 }
0x178c   :  { %v2247_v56 = vpop.xlane.xlu1 %2246 }
0x178d   :  { %v2248_v57 = vmul.f32 0.03125, %v2247_v56 }
0x178f   :  { %v2249_v58 = vadd.f32 1e-12, %v2248_v57 }
0x1791   :  { %2738 = vrsqrt.f32 %v2249_v58 }
0x179e   :  { %v2739_v59 = vpop.eup %2738 }
0x179f   :  { %v2251_v61 = vmul.f32 %v2739_v59, %v2243_v53 }
0x17a1   :  { %v2258_v63 = vmul.f32 %v2363_v60, %v2251_v61 }
0x17a3   :  { %v2265_v1 = vadd.f32 %v2364_v62, %v2258_v63 }
0x17a5   :  { %2266 = vst.msk [vmem:[#allocation2] sm:$0xff] %vm54_vm0, %v2265_v1 }
0x17a6   :  { %2751 = shalt.err (!%p2748_p4)
}
0x17a7   :  { %2276 = dma.vmem_to_hbm [thread:$0]  %s2274_s8, 128, %s3352_s15, [#allocation3]  }
0x17a8   :  { %2760 = dma.done.wait [#allocation3], 128  }
0x17a9   :  { %2761 = vsyncadd [#allocation3], 4294967168 }
0x17aa   :  { %2280 = vsyncpa [#allocation3], 1 }

</bundles_post_ra>
